<compile_context>
chip_gen: v7x
topology: tpu7x:2x2x1
jax: 0.10.0
libtpu: 0.0.40
codegen_flags: <defaults>
</compile_context>

<pallas_src>
import functools

import jax
import jax.numpy as jnp
from jax import lax
from jax.experimental import pallas as pl
from jax.experimental.pallas import tpu as pltpu


LAYER_NORM_EPS = 1e-12


def _round_up(x, m):
    return ((x + m - 1) // m) * m


def _bert_emb_kernel(ids_ref,                                # scalar-prefetch: flat token ids (SMEM)
                     tt_ref, pos_ref, type_ref, gb_ref,      # VMEM blocks
                     w_hbm_ref,                              # word table, stays in HBM (pl.ANY)
                     o_ref,                                  # VMEM output (TOK_TILE, H)
                     wbuf, sem,                              # scratch: (2, TOK_TILE, H) + DMA sems
                     *, tok_tile, n_types, cross_batch):
    b = pl.program_id(0)
    j = pl.program_id(1)
    n_b = pl.num_programs(0)
    n_j = pl.num_programs(1)
    cur_tile = b * n_j + j
    total_tiles = n_b * n_j
    vocab = w_hbm_ref.shape[0]

    def issue_tile(tile_idx, slot):
        # All ids_ref (SMEM) reads happen here, strictly BEFORE any semaphore wait,
        # so sst->sld forwarding is never broken by the wait below.
        base = pl.multiple_of(tile_idx * tok_tile, tok_tile)

        def body(t, carry):
            row = ids_ref[base + t]
            # Clamp to table bounds so a bad id can't DMA out of range.
            row = jnp.minimum(jnp.maximum(row, 0), vocab - 1)
            pltpu.make_async_copy(
                w_hbm_ref.at[pl.ds(row, 1), :],
                wbuf.at[slot, pl.ds(t, 1), :],
                sem.at[slot],
            ).start()
            return carry

        # Partial unroll: lets the scheduler pipeline several descriptors' worth of
        # scalar work (id load, clamp, address math) per loop trip.
        lax.fori_loop(0, tok_tile, body, 0, unroll=min(8, tok_tile))

    if cross_batch:
        # Single-TC friendly mode: prefetch chain runs over the flattened tile
        # index, crossing batch-row boundaries (no per-row cold-start bubble).
        # Both grid axes are marked "arbitrary" by the wrapper in this mode.
        slot = cur_tile % 2

        @pl.when(cur_tile == 0)
        def _():
            issue_tile(0, 0)

        @pl.when(cur_tile + 1 < total_tiles)
        def _():
            issue_tile(cur_tile + 1, (cur_tile + 1) % 2)
    else:
        # Megacore-safe mode: the prefetch chain never crosses the batch axis, so
        # the batch axis can be "parallel" (v7x 2-TC split when B >= 2).
        slot = j % 2

        @pl.when(j == 0)
        def _():
            issue_tile(cur_tile, 0)

        @pl.when(j + 1 < n_j)
        def _():
            issue_tile(cur_tile + 1, (j + 1) % 2)

    # Single aggregate wait for the current tile.  The DMA semaphore counts bytes:
    # TOK_TILE per-row starts of (1, H) rows == TOK_TILE * H * itemsize bytes, which
    # is exactly the transfer size of this one (TOK_TILE, H) wait descriptor
    # (shape-only; the src slice is never read).  The wrapper asserts V >= TOK_TILE.
    pltpu.make_async_copy(
        w_hbm_ref.at[pl.ds(0, tok_tile), :],
        wbuf.at[slot, pl.ds(0, tok_tile), :],
        sem.at[slot],
    ).wait()

    # word + position + token-type embeddings, fp32 accumulation.
    x = wbuf[slot].astype(jnp.float32) + pos_ref[...].astype(jnp.float32)

    if n_types == 2:
        # Common BERT case: single FMA select, no compare/where chain.
        t0 = type_ref[0:1, :].astype(jnp.float32)
        t1 = type_ref[1:2, :].astype(jnp.float32)
        x = x + (t0 + tt_ref[...].astype(jnp.float32) * (t1 - t0))
    else:
        tt = tt_ref[...]                               # (TOK_TILE, 1) int32
        tsel = type_ref[0:1, :].astype(jnp.float32)    # row 0 by default
        for t in range(1, n_types):
            tsel = jnp.where(tt == t, type_ref[t:t + 1, :].astype(jnp.float32), tsel)
        x = x + tsel

    # LayerNorm over the hidden (lane) axis — one-pass statistics so the two XLU
    # reductions are independent (var = E[x^2] - mean^2).
    mean = jnp.mean(x, axis=-1, keepdims=True)
    mean_sq = jnp.mean(x * x, axis=-1, keepdims=True)
    var = mean_sq - mean * mean
    y = (x - mean) * jax.lax.rsqrt(var + LAYER_NORM_EPS)
    y = y * gb_ref[0:1, :].astype(jnp.float32) + gb_ref[1:2, :].astype(jnp.float32)

    # TODO(synk): dropout omitted (eval-mode identity); training-mode dropout would
    # use pltpu.prng_seed + pltpu.stateful_bernoulli here.
    o_ref[...] = y.astype(o_ref.dtype)


def bert_embeddings(input_ids, word_emb, pos_emb, type_emb, gamma, beta,
                    token_type_ids=None, position_ids=None, tok_tile=512,
                    cross_batch_prefetch=None):
    """Pallas implementation of BERTEmbeddings.forward (eval mode).

    Tables may be fp32 or bf16; accumulation is always fp32 in-kernel and the
    output matches word_emb.dtype.
    """
    B, S = input_ids.shape
    V, H = word_emb.shape
    T = type_emb.shape[0]

    if token_type_ids is None:
        token_type_ids = jnp.zeros((B, S), jnp.int32)

    if cross_batch_prefetch is None:
        # B == 1: a "parallel" batch axis buys nothing -> use cross-batch prefetch.
        # B >= 2: keep megacore-safe chain so v7x can split the batch across TCs
        # (on single-TC v5e/v6e this costs ~one tile's gather latency per row only).
        cross_batch_prefetch = (B < 2)

    # Token tile: multiple of 8 sublanes, capped by the (padded) sequence length.
    TOK_TILE = _round_up(max(8, min(tok_tile, _round_up(S, 8))), 8)
    # The aggregate-wait descriptor slices the first TOK_TILE rows of the word
    # table (shape-only); the table must be at least that tall.
    assert V >= TOK_TILE, (V, TOK_TILE)
    S_tiles = (S + TOK_TILE - 1) // TOK_TILE
    S_pad = S_tiles * TOK_TILE
    pad = S_pad - S

    ids = input_ids.astype(jnp.int32)
    tt = token_type_ids.astype(jnp.int32)
    if pad:
        ids = jnp.pad(ids, ((0, 0), (0, pad)))
        tt = jnp.pad(tt, ((0, 0), (0, pad)))
    ids_flat = ids.reshape(B * S_pad)              # SMEM scalar-prefetch
    tt_col = tt.reshape(B * S_pad, 1)              # (TOK_TILE, 1) blocks

    gb = jnp.stack([gamma.reshape(H), beta.reshape(H)], axis=0).astype(jnp.float32)

    if position_ids is None:
        # Default arange positions: rows of a tile are contiguous -> plain blocked spec.
        pos_src = pos_emb[:min(pos_emb.shape[0], S_pad)]
        if pos_src.shape[0] < S_pad:
            pos_src = jnp.pad(pos_src, ((0, S_pad - pos_src.shape[0]), (0, 0)))
        pos_index_map = lambda b, j, ids_ref: (j, 0)
        pos_rows_streamed = S_pad
    else:
        # Rare custom-position path: gather the small position table outside the
        # kernel and stream the rows through the same blocked spec.
        pos_ids = jnp.broadcast_to(position_ids, (B, S)).astype(jnp.int32)
        pos_rows = jnp.take(pos_emb, pos_ids.reshape(-1), axis=0).reshape(B, S, H)
        if pad:
            pos_rows = jnp.pad(pos_rows, ((0, 0), (0, pad), (0, 0)))
        pos_src = pos_rows.reshape(B * S_pad, H)
        pos_index_map = lambda b, j, ids_ref: (b * S_tiles + j, 0)
        pos_rows_streamed = B * S_pad

    w_item = jnp.dtype(word_emb.dtype).itemsize
    p_item = jnp.dtype(pos_src.dtype).itemsize

    # VMEM footprint estimate (double-buffered pipelined blocks + scratch).
    vmem_est = (2 * TOK_TILE * H * w_item          # wbuf gather scratch
                + 2 * TOK_TILE * H * p_item        # pos block
                + 2 * TOK_TILE * H * w_item        # out block
                + 2 * TOK_TILE * 4                 # token-type ids block
                + 2 * (T + 2) * H * 4)             # type table + gamma/beta
    compiler_kwargs = {}
    if vmem_est > (24 << 20):                      # only override when near the scoped default
        compiler_kwargs["vmem_limit_bytes"] = min(int(vmem_est * 1.5), 96 << 20)

    dims = ("arbitrary", "arbitrary") if cross_batch_prefetch else ("parallel", "arbitrary")

    grid_spec = pltpu.PrefetchScalarGridSpec(
        num_scalar_prefetch=1,
        grid=(B, S_tiles),
        in_specs=[
            # token-type ids for this tile
            pl.BlockSpec((TOK_TILE, 1), lambda b, j, ids_ref: (b * S_tiles + j, 0)),
            # position rows for this tile (blocked, no per-token gather)
            pl.BlockSpec((TOK_TILE, H), pos_index_map),
            # full token-type table, VMEM resident
            pl.BlockSpec((T, H), lambda b, j, ids_ref: (0, 0)),
            # gamma/beta packed as one (2, H) constant block
            pl.BlockSpec((2, H), lambda b, j, ids_ref: (0, 0)),
            # word table stays in HBM; gathered manually in-kernel
            pl.BlockSpec(memory_space=pl.ANY),
        ],
        out_specs=pl.BlockSpec((TOK_TILE, H), lambda b, j, ids_ref: (b * S_tiles + j, 0)),
        scratch_shapes=[
            pltpu.VMEM((2, TOK_TILE, H), word_emb.dtype),   # double-buffered gather
            pltpu.SemaphoreType.DMA((2,)),
        ],
    )

    kernel = functools.partial(_bert_emb_kernel, tok_tile=TOK_TILE, n_types=T,
                               cross_batch=cross_batch_prefetch)

    cost = pl.CostEstimate(
        flops=8 * B * S_pad * H,
        transcendentals=B * S_pad,                 # rsqrt per token
        bytes_accessed=(B * S_pad * H * w_item     # word-row gathers
                        + pos_rows_streamed * H * p_item
                        + B * S_pad * H * w_item   # output writes
                        + B * S_pad * 4            # ids
                        + (T + 2) * H * 4),
    )

    out_flat = pl.pallas_call(
        kernel,
        out_shape=jax.ShapeDtypeStruct((B * S_pad, H), word_emb.dtype),
        grid_spec=grid_spec,
        compiler_params=pltpu.CompilerParams(
            dimension_semantics=dims, **compiler_kwargs),
        cost_estimate=cost,
    )(ids_flat, tt_col, pos_src, type_emb, gb, word_emb)

    out = out_flat.reshape(B, S_pad, H)
    if pad:
        out = out[:, :S, :]
    return out


def _reference(input_ids, word_emb, pos_emb, type_emb, gamma, beta, token_type_ids):
    B, S = input_ids.shape
    pos = jnp.broadcast_to(jnp.arange(S, dtype=jnp.int32)[None, :], (B, S))
    x = (word_emb[input_ids] + pos_emb[pos] + type_emb[token_type_ids]).astype(jnp.float32)
    mean = jnp.mean(x, axis=-1, keepdims=True)
    var = jnp.mean((x - mean) ** 2, axis=-1, keepdims=True)
    y = (x - mean) * jax.lax.rsqrt(var + LAYER_NORM_EPS)
    return y * gamma + beta


if __name__ == "__main__":
    # Small, BERT-shaped synthetic config (exercises multi-tile + padding paths).
    VOCAB = 1000
    HIDDEN = 128
    MAX_POS = 64
    TYPE_VOCAB = 2
    B, S = 2, 28          # S not a multiple of the tile -> padding path
    TOK_TILE = 8          # small tile so the grid has several steps per sequence

    key = jax.random.PRNGKey(0)
    k_w, k_p, k_t, k_ids, k_tt = jax.random.split(key, 5)

    # Deterministic parameter init (BERT-style N(0, 0.02), LN gamma=1, beta=0).
    word_emb = (0.02 * jax.random.normal(k_w, (VOCAB, HIDDEN))).astype(jnp.float32)
    pos_emb = (0.02 * jax.random.normal(k_p, (MAX_POS, HIDDEN))).astype(jnp.float32)
    type_emb = (0.02 * jax.random.normal(k_t, (TYPE_VOCAB, HIDDEN))).astype(jnp.float32)
    gamma = jnp.ones((HIDDEN,), jnp.float32)
    beta = jnp.zeros((HIDDEN,), jnp.float32)

    input_ids = jax.random.randint(k_ids, (B, S), 0, VOCAB, dtype=jnp.int32)
    token_type_ids = jax.random.randint(k_tt, (B, S), 0, TYPE_VOCAB, dtype=jnp.int32)

    ref = _reference(input_ids, word_emb, pos_emb, type_emb, gamma, beta, token_type_ids)

    # Megacore-safe mode (B >= 2 default: batch axis "parallel").
    out_mc = bert_embeddings(input_ids, word_emb, pos_emb, type_emb, gamma, beta,
                             token_type_ids=token_type_ids, tok_tile=TOK_TILE)
    out_mc = jax.block_until_ready(out_mc)
    assert out_mc.shape == (B, S, HIDDEN), out_mc.shape
    assert jnp.allclose(out_mc, ref, atol=1e-4, rtol=1e-4), \
        float(jnp.max(jnp.abs(out_mc - ref)))

    # Cross-batch-prefetch mode (single-TC chips / B == 1 path).
    out_cb = bert_embeddings(input_ids, word_emb, pos_emb, type_emb, gamma, beta,
                             token_type_ids=token_type_ids, tok_tile=TOK_TILE,
                             cross_batch_prefetch=True)
    out_cb = jax.block_until_ready(out_cb)
    assert jnp.allclose(out_cb, ref, atol=1e-4, rtol=1e-4), \
        float(jnp.max(jnp.abs(out_cb - ref)))

    print("KERNEL_OK")
</pallas_src>

<mosaic_0001>
module attributes {stable_mosaic.version = 11 : i64} {
  func.func @_bert_emb_kernel(%arg0: i32, %arg1: i32, %arg2: memref<64xi32, #tpu.memory_space<smem>>, %arg3: memref<8x1xi32, #tpu.memory_space<vmem>>, %arg4: memref<8x128xf32, #tpu.memory_space<vmem>>, %arg5: memref<2x128xf32, #tpu.memory_space<vmem>>, %arg6: memref<2x128xf32, #tpu.memory_space<vmem>>, %arg7: memref<1000x128xf32, #tpu.memory_space<any>>, %arg8: memref<8x128xf32, #tpu.memory_space<vmem>>, %arg9: memref<2x8x128xf32, #tpu.memory_space<vmem>>, %arg10: memref<2x!tpu.dma_semaphore, #tpu.memory_space<semaphore_mem>>) attributes {dimension_semantics = [#tpu.dimension_semantics<parallel>, #tpu.dimension_semantics<arbitrary>], iteration_bounds = array<i64: 2, 4>, scalar_prefetch = 1 : i64, scratch_operands = 2 : i64, tpu.core_type = #tpu.core_type<tc>, window_params = [{transform_indices = @transform_0, window_bounds = array<i64: 8, 1>}, {transform_indices = @transform_1, window_bounds = array<i64: 8, 128>}, {pipeline_mode = #tpu.pipeline_mode<synchronous>, transform_indices = @transform_2, window_bounds = array<i64: 2, 128>}, {pipeline_mode = #tpu.pipeline_mode<synchronous>, transform_indices = @transform_3, window_bounds = array<i64: 2, 128>}, {}, {transform_indices = @transform_5, window_bounds = array<i64: 8, 128>}]} {
    %c4_i32 = arith.constant 4 : i32
    %0 = arith.muli %arg0, %c4_i32 : i32
    %1 = arith.addi %0, %arg1 : i32
    %c2_i32 = arith.constant 2 : i32
    %c0_i32 = arith.constant 0 : i32
    %2 = arith.cmpi eq, %c2_i32, %c0_i32 : i32
    %c1_i32 = arith.constant 1 : i32
    %3 = arith.select %2, %c1_i32, %c2_i32 : i32
    %4 = arith.remsi %arg1, %3 : i32
    %c0_i32_0 = arith.constant 0 : i32
    %5 = arith.cmpi ne, %4, %c0_i32_0 : i32
    %c0_i32_1 = arith.constant 0 : i32
    %6 = arith.cmpi slt, %4, %c0_i32_1 : i32
    %c0_i32_2 = arith.constant 0 : i32
    %7 = arith.cmpi slt, %3, %c0_i32_2 : i32
    %8 = arith.xori %6, %7 : i1
    %9 = arith.andi %8, %5 : i1
    %10 = arith.addi %4, %3 : i32
    %11 = arith.select %9, %10, %4 : i32
    %c0_i32_3 = arith.constant 0 : i32
    %12 = arith.cmpi eq, %arg1, %c0_i32_3 : i32
    %13 = arith.extui %12 : i1 to i32
    %c0_i32_4 = arith.constant 0 : i32
    %14 = arith.cmpi ne, %13, %c0_i32_4 : i32
    scf.if %14 {
      %c8_i32 = arith.constant 8 : i32
      %65 = arith.muli %1, %c8_i32 : i32
      %66 = tpu.assume_multiple %65, 8 : i32
      %c0_i32_30 = arith.constant 0 : i32
      %67 = arith.addi %66, %c0_i32_30 : i32
      %68 = arith.index_cast %67 : i32 to index
      %69 = memref.load %arg2[%68] : memref<64xi32, #tpu.memory_space<smem>>
      %c0_i32_31 = arith.constant 0 : i32
      %70 = arith.maxsi %69, %c0_i32_31 : i32
      %c999_i32 = arith.constant 999 : i32
      %71 = arith.minsi %70, %c999_i32 : i32
      %c0_i32_32 = arith.constant 0 : i32
      %c0_i32_33 = arith.constant 0 : i32
      %c0_i32_34 = arith.constant 0 : i32
      %72 = tpu.memref_slice %arg7[%71, %c0_i32_34] : memref<1000x128xf32, #tpu.memory_space<any>> -> memref<1x128xf32, #tpu.memory_space<any>>
      %c0_i32_35 = arith.constant 0 : i32
      %73 = tpu.memref_slice %arg9[%c0_i32_32, %c0_i32_30, %c0_i32_35] : memref<2x8x128xf32, #tpu.memory_space<vmem>> -> memref<1x1x128xf32, #tpu.memory_space<vmem>>
      %74 = tpu.memref_squeeze %73 : memref<1x1x128xf32, #tpu.memory_space<vmem>> -> memref<1x128xf32, #tpu.memory_space<vmem>>
      %75 = tpu.memref_slice %arg10[%c0_i32_33] : memref<2x!tpu.dma_semaphore, #tpu.memory_space<semaphore_mem>> -> memref<1x!tpu.dma_semaphore, #tpu.memory_space<semaphore_mem>>
      %76 = tpu.memref_squeeze %75 : memref<1x!tpu.dma_semaphore, #tpu.memory_space<semaphore_mem>> -> memref<!tpu.dma_semaphore, #tpu.memory_space<semaphore_mem>>
      tpu.enqueue_dma source(%72 : memref<1x128xf32, #tpu.memory_space<any>>) target(%74 : memref<1x128xf32, #tpu.memory_space<vmem>>) target_semaphore(%76 : memref<!tpu.dma_semaphore, #tpu.memory_space<semaphore_mem>>)
      %c1_i32_36 = arith.constant 1 : i32
      %77 = arith.addi %66, %c1_i32_36 : i32
      %78 = arith.index_cast %77 : i32 to index
      %79 = memref.load %arg2[%78] : memref<64xi32, #tpu.memory_space<smem>>
      %c0_i32_37 = arith.constant 0 : i32
      %80 = arith.maxsi %79, %c0_i32_37 : i32
      %c999_i32_38 = arith.constant 999 : i32
      %81 = arith.minsi %80, %c999_i32_38 : i32
      %c0_i32_39 = arith.constant 0 : i32
      %c0_i32_40 = arith.constant 0 : i32
      %c0_i32_41 = arith.constant 0 : i32
      %82 = tpu.memref_slice %arg7[%81, %c0_i32_41] : memref<1000x128xf32, #tpu.memory_space<any>> -> memref<1x128xf32, #tpu.memory_space<any>>
      %c0_i32_42 = arith.constant 0 : i32
      %83 = tpu.memref_slice %arg9[%c0_i32_39, %c1_i32_36, %c0_i32_42] : memref<2x8x128xf32, #tpu.memory_space<vmem>> -> memref<1x1x128xf32, #tpu.memory_space<vmem>>
      %84 = tpu.memref_squeeze %83 : memref<1x1x128xf32, #tpu.memory_space<vmem>> -> memref<1x128xf32, #tpu.memory_space<vmem>>
      %85 = tpu.memref_slice %arg10[%c0_i32_40] : memref<2x!tpu.dma_semaphore, #tpu.memory_space<semaphore_mem>> -> memref<1x!tpu.dma_semaphore, #tpu.memory_space<semaphore_mem>>
      %86 = tpu.memref_squeeze %85 : memref<1x!tpu.dma_semaphore, #tpu.memory_space<semaphore_mem>> -> memref<!tpu.dma_semaphore, #tpu.memory_space<semaphore_mem>>
      tpu.enqueue_dma source(%82 : memref<1x128xf32, #tpu.memory_space<any>>) target(%84 : memref<1x128xf32, #tpu.memory_space<vmem>>) target_semaphore(%86 : memref<!tpu.dma_semaphore, #tpu.memory_space<semaphore_mem>>)
      %c2_i32_43 = arith.constant 2 : i32
      %87 = arith.addi %66, %c2_i32_43 : i32
      %88 = arith.index_cast %87 : i32 to index
      %89 = memref.load %arg2[%88] : memref<64xi32, #tpu.memory_space<smem>>
      %c0_i32_44 = arith.constant 0 : i32
      %90 = arith.maxsi %89, %c0_i32_44 : i32
      %c999_i32_45 = arith.constant 999 : i32
      %91 = arith.minsi %90, %c999_i32_45 : i32
      %c0_i32_46 = arith.constant 0 : i32
      %c0_i32_47 = arith.constant 0 : i32
      %c0_i32_48 = arith.constant 0 : i32
      %92 = tpu.memref_slice %arg7[%91, %c0_i32_48] : memref<1000x128xf32, #tpu.memory_space<any>> -> memref<1x128xf32, #tpu.memory_space<any>>
      %c0_i32_49 = arith.constant 0 : i32
      %93 = tpu.memref_slice %arg9[%c0_i32_46, %c2_i32_43, %c0_i32_49] : memref<2x8x128xf32, #tpu.memory_space<vmem>> -> memref<1x1x128xf32, #tpu.memory_space<vmem>>
      %94 = tpu.memref_squeeze %93 : memref<1x1x128xf32, #tpu.memory_space<vmem>> -> memref<1x128xf32, #tpu.memory_space<vmem>>
      %95 = tpu.memref_slice %arg10[%c0_i32_47] : memref<2x!tpu.dma_semaphore, #tpu.memory_space<semaphore_mem>> -> memref<1x!tpu.dma_semaphore, #tpu.memory_space<semaphore_mem>>
      %96 = tpu.memref_squeeze %95 : memref<1x!tpu.dma_semaphore, #tpu.memory_space<semaphore_mem>> -> memref<!tpu.dma_semaphore, #tpu.memory_space<semaphore_mem>>
      tpu.enqueue_dma source(%92 : memref<1x128xf32, #tpu.memory_space<any>>) target(%94 : memref<1x128xf32, #tpu.memory_space<vmem>>) target_semaphore(%96 : memref<!tpu.dma_semaphore, #tpu.memory_space<semaphore_mem>>)
      %c3_i32 = arith.constant 3 : i32
      %97 = arith.addi %66, %c3_i32 : i32
      %98 = arith.index_cast %97 : i32 to index
      %99 = memref.load %arg2[%98] : memref<64xi32, #tpu.memory_space<smem>>
      %c0_i32_50 = arith.constant 0 : i32
      %100 = arith.maxsi %99, %c0_i32_50 : i32
      %c999_i32_51 = arith.constant 999 : i32
      %101 = arith.minsi %100, %c999_i32_51 : i32
      %c0_i32_52 = arith.constant 0 : i32
      %c0_i32_53 = arith.constant 0 : i32
      %c0_i32_54 = arith.constant 0 : i32
      %102 = tpu.memref_slice %arg7[%101, %c0_i32_54] : memref<1000x128xf32, #tpu.memory_space<any>> -> memref<1x128xf32, #tpu.memory_space<any>>
      %c0_i32_55 = arith.constant 0 : i32
      %103 = tpu.memref_slice %arg9[%c0_i32_52, %c3_i32, %c0_i32_55] : memref<2x8x128xf32, #tpu.memory_space<vmem>> -> memref<1x1x128xf32, #tpu.memory_space<vmem>>
      %104 = tpu.memref_squeeze %103 : memref<1x1x128xf32, #tpu.memory_space<vmem>> -> memref<1x128xf32, #tpu.memory_space<vmem>>
      %105 = tpu.memref_slice %arg10[%c0_i32_53] : memref<2x!tpu.dma_semaphore, #tpu.memory_space<semaphore_mem>> -> memref<1x!tpu.dma_semaphore, #tpu.memory_space<semaphore_mem>>
      %106 = tpu.memref_squeeze %105 : memref<1x!tpu.dma_semaphore, #tpu.memory_space<semaphore_mem>> -> memref<!tpu.dma_semaphore, #tpu.memory_space<semaphore_mem>>
      tpu.enqueue_dma source(%102 : memref<1x128xf32, #tpu.memory_space<any>>) target(%104 : memref<1x128xf32, #tpu.memory_space<vmem>>) target_semaphore(%106 : memref<!tpu.dma_semaphore, #tpu.memory_space<semaphore_mem>>)
      %c4_i32_56 = arith.constant 4 : i32
      %107 = arith.addi %66, %c4_i32_56 : i32
      %108 = arith.index_cast %107 : i32 to index
      %109 = memref.load %arg2[%108] : memref<64xi32, #tpu.memory_space<smem>>
      %c0_i32_57 = arith.constant 0 : i32
      %110 = arith.maxsi %109, %c0_i32_57 : i32
      %c999_i32_58 = arith.constant 999 : i32
      %111 = arith.minsi %110, %c999_i32_58 : i32
      %c0_i32_59 = arith.constant 0 : i32
      %c0_i32_60 = arith.constant 0 : i32
      %c0_i32_61 = arith.constant 0 : i32
      %112 = tpu.memref_slice %arg7[%111, %c0_i32_61] : memref<1000x128xf32, #tpu.memory_space<any>> -> memref<1x128xf32, #tpu.memory_space<any>>
      %c0_i32_62 = arith.constant 0 : i32
      %113 = tpu.memref_slice %arg9[%c0_i32_59, %c4_i32_56, %c0_i32_62] : memref<2x8x128xf32, #tpu.memory_space<vmem>> -> memref<1x1x128xf32, #tpu.memory_space<vmem>>
      %114 = tpu.memref_squeeze %113 : memref<1x1x128xf32, #tpu.memory_space<vmem>> -> memref<1x128xf32, #tpu.memory_space<vmem>>
      %115 = tpu.memref_slice %arg10[%c0_i32_60] : memref<2x!tpu.dma_semaphore, #tpu.memory_space<semaphore_mem>> -> memref<1x!tpu.dma_semaphore, #tpu.memory_space<semaphore_mem>>
      %116 = tpu.memref_squeeze %115 : memref<1x!tpu.dma_semaphore, #tpu.memory_space<semaphore_mem>> -> memref<!tpu.dma_semaphore, #tpu.memory_space<semaphore_mem>>
      tpu.enqueue_dma source(%112 : memref<1x128xf32, #tpu.memory_space<any>>) target(%114 : memref<1x128xf32, #tpu.memory_space<vmem>>) target_semaphore(%116 : memref<!tpu.dma_semaphore, #tpu.memory_space<semaphore_mem>>)
      %c5_i32 = arith.constant 5 : i32
      %117 = arith.addi %66, %c5_i32 : i32
      %118 = arith.index_cast %117 : i32 to index
      %119 = memref.load %arg2[%118] : memref<64xi32, #tpu.memory_space<smem>>
      %c0_i32_63 = arith.constant 0 : i32
      %120 = arith.maxsi %119, %c0_i32_63 : i32
      %c999_i32_64 = arith.constant 999 : i32
      %121 = arith.minsi %120, %c999_i32_64 : i32
      %c0_i32_65 = arith.constant 0 : i32
      %c0_i32_66 = arith.constant 0 : i32
      %c0_i32_67 = arith.constant 0 : i32
      %122 = tpu.memref_slice %arg7[%121, %c0_i32_67] : memref<1000x128xf32, #tpu.memory_space<any>> -> memref<1x128xf32, #tpu.memory_space<any>>
      %c0_i32_68 = arith.constant 0 : i32
      %123 = tpu.memref_slice %arg9[%c0_i32_65, %c5_i32, %c0_i32_68] : memref<2x8x128xf32, #tpu.memory_space<vmem>> -> memref<1x1x128xf32, #tpu.memory_space<vmem>>
      %124 = tpu.memref_squeeze %123 : memref<1x1x128xf32, #tpu.memory_space<vmem>> -> memref<1x128xf32, #tpu.memory_space<vmem>>
      %125 = tpu.memref_slice %arg10[%c0_i32_66] : memref<2x!tpu.dma_semaphore, #tpu.memory_space<semaphore_mem>> -> memref<1x!tpu.dma_semaphore, #tpu.memory_space<semaphore_mem>>
      %126 = tpu.memref_squeeze %125 : memref<1x!tpu.dma_semaphore, #tpu.memory_space<semaphore_mem>> -> memref<!tpu.dma_semaphore, #tpu.memory_space<semaphore_mem>>
      tpu.enqueue_dma source(%122 : memref<1x128xf32, #tpu.memory_space<any>>) target(%124 : memref<1x128xf32, #tpu.memory_space<vmem>>) target_semaphore(%126 : memref<!tpu.dma_semaphore, #tpu.memory_space<semaphore_mem>>)
      %c6_i32 = arith.constant 6 : i32
      %127 = arith.addi %66, %c6_i32 : i32
      %128 = arith.index_cast %127 : i32 to index
      %129 = memref.load %arg2[%128] : memref<64xi32, #tpu.memory_space<smem>>
      %c0_i32_69 = arith.constant 0 : i32
      %130 = arith.maxsi %129, %c0_i32_69 : i32
      %c999_i32_70 = arith.constant 999 : i32
      %131 = arith.minsi %130, %c999_i32_70 : i32
      %c0_i32_71 = arith.constant 0 : i32
      %c0_i32_72 = arith.constant 0 : i32
      %c0_i32_73 = arith.constant 0 : i32
      %132 = tpu.memref_slice %arg7[%131, %c0_i32_73] : memref<1000x128xf32, #tpu.memory_space<any>> -> memref<1x128xf32, #tpu.memory_space<any>>
      %c0_i32_74 = arith.constant 0 : i32
      %133 = tpu.memref_slice %arg9[%c0_i32_71, %c6_i32, %c0_i32_74] : memref<2x8x128xf32, #tpu.memory_space<vmem>> -> memref<1x1x128xf32, #tpu.memory_space<vmem>>
      %134 = tpu.memref_squeeze %133 : memref<1x1x128xf32, #tpu.memory_space<vmem>> -> memref<1x128xf32, #tpu.memory_space<vmem>>
      %135 = tpu.memref_slice %arg10[%c0_i32_72] : memref<2x!tpu.dma_semaphore, #tpu.memory_space<semaphore_mem>> -> memref<1x!tpu.dma_semaphore, #tpu.memory_space<semaphore_mem>>
      %136 = tpu.memref_squeeze %135 : memref<1x!tpu.dma_semaphore, #tpu.memory_space<semaphore_mem>> -> memref<!tpu.dma_semaphore, #tpu.memory_space<semaphore_mem>>
      tpu.enqueue_dma source(%132 : memref<1x128xf32, #tpu.memory_space<any>>) target(%134 : memref<1x128xf32, #tpu.memory_space<vmem>>) target_semaphore(%136 : memref<!tpu.dma_semaphore, #tpu.memory_space<semaphore_mem>>)
      %c7_i32 = arith.constant 7 : i32
      %137 = arith.addi %66, %c7_i32 : i32
      %138 = arith.index_cast %137 : i32 to index
      %139 = memref.load %arg2[%138] : memref<64xi32, #tpu.memory_space<smem>>
      %c0_i32_75 = arith.constant 0 : i32
      %140 = arith.maxsi %139, %c0_i32_75 : i32
      %c999_i32_76 = arith.constant 999 : i32
      %141 = arith.minsi %140, %c999_i32_76 : i32
      %c0_i32_77 = arith.constant 0 : i32
      %c0_i32_78 = arith.constant 0 : i32
      %c0_i32_79 = arith.constant 0 : i32
      %142 = tpu.memref_slice %arg7[%141, %c0_i32_79] : memref<1000x128xf32, #tpu.memory_space<any>> -> memref<1x128xf32, #tpu.memory_space<any>>
      %c0_i32_80 = arith.constant 0 : i32
      %143 = tpu.memref_slice %arg9[%c0_i32_77, %c7_i32, %c0_i32_80] : memref<2x8x128xf32, #tpu.memory_space<vmem>> -> memref<1x1x128xf32, #tpu.memory_space<vmem>>
      %144 = tpu.memref_squeeze %143 : memref<1x1x128xf32, #tpu.memory_space<vmem>> -> memref<1x128xf32, #tpu.memory_space<vmem>>
      %145 = tpu.memref_slice %arg10[%c0_i32_78] : memref<2x!tpu.dma_semaphore, #tpu.memory_space<semaphore_mem>> -> memref<1x!tpu.dma_semaphore, #tpu.memory_space<semaphore_mem>>
      %146 = tpu.memref_squeeze %145 : memref<1x!tpu.dma_semaphore, #tpu.memory_space<semaphore_mem>> -> memref<!tpu.dma_semaphore, #tpu.memory_space<semaphore_mem>>
      tpu.enqueue_dma source(%142 : memref<1x128xf32, #tpu.memory_space<any>>) target(%144 : memref<1x128xf32, #tpu.memory_space<vmem>>) target_semaphore(%146 : memref<!tpu.dma_semaphore, #tpu.memory_space<semaphore_mem>>)
      %c8_i32_81 = arith.constant 8 : i32
    } else {
    }
    %c1_i32_5 = arith.constant 1 : i32
    %15 = arith.addi %arg1, %c1_i32_5 : i32
    %c4_i32_6 = arith.constant 4 : i32
    %16 = arith.cmpi slt, %15, %c4_i32_6 : i32
    %17 = arith.extui %16 : i1 to i32
    %c0_i32_7 = arith.constant 0 : i32
    %18 = arith.cmpi ne, %17, %c0_i32_7 : i32
    scf.if %18 {
      %c1_i32_30 = arith.constant 1 : i32
      %65 = arith.addi %1, %c1_i32_30 : i32
      %c1_i32_31 = arith.constant 1 : i32
      %66 = arith.addi %arg1, %c1_i32_31 : i32
      %c2_i32_32 = arith.constant 2 : i32
      %c0_i32_33 = arith.constant 0 : i32
      %67 = arith.cmpi eq, %c2_i32_32, %c0_i32_33 : i32
      %c1_i32_34 = arith.constant 1 : i32
      %68 = arith.select %67, %c1_i32_34, %c2_i32_32 : i32
      %69 = arith.remsi %66, %68 : i32
      %c0_i32_35 = arith.constant 0 : i32
      %70 = arith.cmpi ne, %69, %c0_i32_35 : i32
      %c0_i32_36 = arith.constant 0 : i32
      %71 = arith.cmpi slt, %69, %c0_i32_36 : i32
      %c0_i32_37 = arith.constant 0 : i32
      %72 = arith.cmpi slt, %68, %c0_i32_37 : i32
      %73 = arith.xori %71, %72 : i1
      %74 = arith.andi %73, %70 : i1
      %75 = arith.addi %69, %68 : i32
      %76 = arith.select %74, %75, %69 : i32
      %c8_i32 = arith.constant 8 : i32
      %77 = arith.muli %65, %c8_i32 : i32
      %78 = tpu.assume_multiple %77, 8 : i32
      %c0_i32_38 = arith.constant 0 : i32
      %79 = arith.addi %78, %c0_i32_38 : i32
      %80 = arith.index_cast %79 : i32 to index
      %81 = memref.load %arg2[%80] : memref<64xi32, #tpu.memory_space<smem>>
      %c0_i32_39 = arith.constant 0 : i32
      %82 = arith.maxsi %81, %c0_i32_39 : i32
      %c999_i32 = arith.constant 999 : i32
      %83 = arith.minsi %82, %c999_i32 : i32
      %c0_i32_40 = arith.constant 0 : i32
      %84 = tpu.memref_slice %arg7[%83, %c0_i32_40] : memref<1000x128xf32, #tpu.memory_space<any>> -> memref<1x128xf32, #tpu.memory_space<any>>
      %c0_i32_41 = arith.constant 0 : i32
      %85 = tpu.memref_slice %arg9[%76, %c0_i32_38, %c0_i32_41] : memref<2x8x128xf32, #tpu.memory_space<vmem>> -> memref<1x1x128xf32, #tpu.memory_space<vmem>>
      %86 = tpu.memref_squeeze %85 : memref<1x1x128xf32, #tpu.memory_space<vmem>> -> memref<1x128xf32, #tpu.memory_space<vmem>>
      %87 = tpu.memref_slice %arg10[%76] : memref<2x!tpu.dma_semaphore, #tpu.memory_space<semaphore_mem>> -> memref<1x!tpu.dma_semaphore, #tpu.memory_space<semaphore_mem>>
      %88 = tpu.memref_squeeze %87 : memref<1x!tpu.dma_semaphore, #tpu.memory_space<semaphore_mem>> -> memref<!tpu.dma_semaphore, #tpu.memory_space<semaphore_mem>>
      tpu.enqueue_dma source(%84 : memref<1x128xf32, #tpu.memory_space<any>>) target(%86 : memref<1x128xf32, #tpu.memory_space<vmem>>) target_semaphore(%88 : memref<!tpu.dma_semaphore, #tpu.memory_space<semaphore_mem>>)
      %c1_i32_42 = arith.constant 1 : i32
      %89 = arith.addi %78, %c1_i32_42 : i32
      %90 = arith.index_cast %89 : i32 to index
      %91 = memref.load %arg2[%90] : memref<64xi32, #tpu.memory_space<smem>>
      %c0_i32_43 = arith.constant 0 : i32
      %92 = arith.maxsi %91, %c0_i32_43 : i32
      %c999_i32_44 = arith.constant 999 : i32
      %93 = arith.minsi %92, %c999_i32_44 : i32
      %c0_i32_45 = arith.constant 0 : i32
      %94 = tpu.memref_slice %arg7[%93, %c0_i32_45] : memref<1000x128xf32, #tpu.memory_space<any>> -> memref<1x128xf32, #tpu.memory_space<any>>
      %c0_i32_46 = arith.constant 0 : i32
      %95 = tpu.memref_slice %arg9[%76, %c1_i32_42, %c0_i32_46] : memref<2x8x128xf32, #tpu.memory_space<vmem>> -> memref<1x1x128xf32, #tpu.memory_space<vmem>>
      %96 = tpu.memref_squeeze %95 : memref<1x1x128xf32, #tpu.memory_space<vmem>> -> memref<1x128xf32, #tpu.memory_space<vmem>>
      %97 = tpu.memref_slice %arg10[%76] : memref<2x!tpu.dma_semaphore, #tpu.memory_space<semaphore_mem>> -> memref<1x!tpu.dma_semaphore, #tpu.memory_space<semaphore_mem>>
      %98 = tpu.memref_squeeze %97 : memref<1x!tpu.dma_semaphore, #tpu.memory_space<semaphore_mem>> -> memref<!tpu.dma_semaphore, #tpu.memory_space<semaphore_mem>>
      tpu.enqueue_dma source(%94 : memref<1x128xf32, #tpu.memory_space<any>>) target(%96 : memref<1x128xf32, #tpu.memory_space<vmem>>) target_semaphore(%98 : memref<!tpu.dma_semaphore, #tpu.memory_space<semaphore_mem>>)
      %c2_i32_47 = arith.constant 2 : i32
      %99 = arith.addi %78, %c2_i32_47 : i32
      %100 = arith.index_cast %99 : i32 to index
      %101 = memref.load %arg2[%100] : memref<64xi32, #tpu.memory_space<smem>>
      %c0_i32_48 = arith.constant 0 : i32
      %102 = arith.maxsi %101, %c0_i32_48 : i32
      %c999_i32_49 = arith.constant 999 : i32
      %103 = arith.minsi %102, %c999_i32_49 : i32
      %c0_i32_50 = arith.constant 0 : i32
      %104 = tpu.memref_slice %arg7[%103, %c0_i32_50] : memref<1000x128xf32, #tpu.memory_space<any>> -> memref<1x128xf32, #tpu.memory_space<any>>
      %c0_i32_51 = arith.constant 0 : i32
      %105 = tpu.memref_slice %arg9[%76, %c2_i32_47, %c0_i32_51] : memref<2x8x128xf32, #tpu.memory_space<vmem>> -> memref<1x1x128xf32, #tpu.memory_space<vmem>>
      %106 = tpu.memref_squeeze %105 : memref<1x1x128xf32, #tpu.memory_space<vmem>> -> memref<1x128xf32, #tpu.memory_space<vmem>>
      %107 = tpu.memref_slice %arg10[%76] : memref<2x!tpu.dma_semaphore, #tpu.memory_space<semaphore_mem>> -> memref<1x!tpu.dma_semaphore, #tpu.memory_space<semaphore_mem>>
      %108 = tpu.memref_squeeze %107 : memref<1x!tpu.dma_semaphore, #tpu.memory_space<semaphore_mem>> -> memref<!tpu.dma_semaphore, #tpu.memory_space<semaphore_mem>>
      tpu.enqueue_dma source(%104 : memref<1x128xf32, #tpu.memory_space<any>>) target(%106 : memref<1x128xf32, #tpu.memory_space<vmem>>) target_semaphore(%108 : memref<!tpu.dma_semaphore, #tpu.memory_space<semaphore_mem>>)
      %c3_i32 = arith.constant 3 : i32
      %109 = arith.addi %78, %c3_i32 : i32
      %110 = arith.index_cast %109 : i32 to index
      %111 = memref.load %arg2[%110] : memref<64xi32, #tpu.memory_space<smem>>
      %c0_i32_52 = arith.constant 0 : i32
      %112 = arith.maxsi %111, %c0_i32_52 : i32
      %c999_i32_53 = arith.constant 999 : i32
      %113 = arith.minsi %112, %c999_i32_53 : i32
      %c0_i32_54 = arith.constant 0 : i32
      %114 = tpu.memref_slice %arg7[%113, %c0_i32_54] : memref<1000x128xf32, #tpu.memory_space<any>> -> memref<1x128xf32, #tpu.memory_space<any>>
      %c0_i32_55 = arith.constant 0 : i32
      %115 = tpu.memref_slice %arg9[%76, %c3_i32, %c0_i32_55] : memref<2x8x128xf32, #tpu.memory_space<vmem>> -> memref<1x1x128xf32, #tpu.memory_space<vmem>>
      %116 = tpu.memref_squeeze %115 : memref<1x1x128xf32, #tpu.memory_space<vmem>> -> memref<1x128xf32, #tpu.memory_space<vmem>>
      %117 = tpu.memref_slice %arg10[%76] : memref<2x!tpu.dma_semaphore, #tpu.memory_space<semaphore_mem>> -> memref<1x!tpu.dma_semaphore, #tpu.memory_space<semaphore_mem>>
      %118 = tpu.memref_squeeze %117 : memref<1x!tpu.dma_semaphore, #tpu.memory_space<semaphore_mem>> -> memref<!tpu.dma_semaphore, #tpu.memory_space<semaphore_mem>>
      tpu.enqueue_dma source(%114 : memref<1x128xf32, #tpu.memory_space<any>>) target(%116 : memref<1x128xf32, #tpu.memory_space<vmem>>) target_semaphore(%118 : memref<!tpu.dma_semaphore, #tpu.memory_space<semaphore_mem>>)
      %c4_i32_56 = arith.constant 4 : i32
      %119 = arith.addi %78, %c4_i32_56 : i32
      %120 = arith.index_cast %119 : i32 to index
      %121 = memref.load %arg2[%120] : memref<64xi32, #tpu.memory_space<smem>>
      %c0_i32_57 = arith.constant 0 : i32
      %122 = arith.maxsi %121, %c0_i32_57 : i32
      %c999_i32_58 = arith.constant 999 : i32
      %123 = arith.minsi %122, %c999_i32_58 : i32
      %c0_i32_59 = arith.constant 0 : i32
      %124 = tpu.memref_slice %arg7[%123, %c0_i32_59] : memref<1000x128xf32, #tpu.memory_space<any>> -> memref<1x128xf32, #tpu.memory_space<any>>
      %c0_i32_60 = arith.constant 0 : i32
      %125 = tpu.memref_slice %arg9[%76, %c4_i32_56, %c0_i32_60] : memref<2x8x128xf32, #tpu.memory_space<vmem>> -> memref<1x1x128xf32, #tpu.memory_space<vmem>>
      %126 = tpu.memref_squeeze %125 : memref<1x1x128xf32, #tpu.memory_space<vmem>> -> memref<1x128xf32, #tpu.memory_space<vmem>>
      %127 = tpu.memref_slice %arg10[%76] : memref<2x!tpu.dma_semaphore, #tpu.memory_space<semaphore_mem>> -> memref<1x!tpu.dma_semaphore, #tpu.memory_space<semaphore_mem>>
      %128 = tpu.memref_squeeze %127 : memref<1x!tpu.dma_semaphore, #tpu.memory_space<semaphore_mem>> -> memref<!tpu.dma_semaphore, #tpu.memory_space<semaphore_mem>>
      tpu.enqueue_dma source(%124 : memref<1x128xf32, #tpu.memory_space<any>>) target(%126 : memref<1x128xf32, #tpu.memory_space<vmem>>) target_semaphore(%128 : memref<!tpu.dma_semaphore, #tpu.memory_space<semaphore_mem>>)
      %c5_i32 = arith.constant 5 : i32
      %129 = arith.addi %78, %c5_i32 : i32
      %130 = arith.index_cast %129 : i32 to index
      %131 = memref.load %arg2[%130] : memref<64xi32, #tpu.memory_space<smem>>
      %c0_i32_61 = arith.constant 0 : i32
      %132 = arith.maxsi %131, %c0_i32_61 : i32
      %c999_i32_62 = arith.constant 999 : i32
      %133 = arith.minsi %132, %c999_i32_62 : i32
      %c0_i32_63 = arith.constant 0 : i32
      %134 = tpu.memref_slice %arg7[%133, %c0_i32_63] : memref<1000x128xf32, #tpu.memory_space<any>> -> memref<1x128xf32, #tpu.memory_space<any>>
      %c0_i32_64 = arith.constant 0 : i32
      %135 = tpu.memref_slice %arg9[%76, %c5_i32, %c0_i32_64] : memref<2x8x128xf32, #tpu.memory_space<vmem>> -> memref<1x1x128xf32, #tpu.memory_space<vmem>>
      %136 = tpu.memref_squeeze %135 : memref<1x1x128xf32, #tpu.memory_space<vmem>> -> memref<1x128xf32, #tpu.memory_space<vmem>>
      %137 = tpu.memref_slice %arg10[%76] : memref<2x!tpu.dma_semaphore, #tpu.memory_space<semaphore_mem>> -> memref<1x!tpu.dma_semaphore, #tpu.memory_space<semaphore_mem>>
      %138 = tpu.memref_squeeze %137 : memref<1x!tpu.dma_semaphore, #tpu.memory_space<semaphore_mem>> -> memref<!tpu.dma_semaphore, #tpu.memory_space<semaphore_mem>>
      tpu.enqueue_dma source(%134 : memref<1x128xf32, #tpu.memory_space<any>>) target(%136 : memref<1x128xf32, #tpu.memory_space<vmem>>) target_semaphore(%138 : memref<!tpu.dma_semaphore, #tpu.memory_space<semaphore_mem>>)
      %c6_i32 = arith.constant 6 : i32
      %139 = arith.addi %78, %c6_i32 : i32
      %140 = arith.index_cast %139 : i32 to index
      %141 = memref.load %arg2[%140] : memref<64xi32, #tpu.memory_space<smem>>
      %c0_i32_65 = arith.constant 0 : i32
      %142 = arith.maxsi %141, %c0_i32_65 : i32
      %c999_i32_66 = arith.constant 999 : i32
      %143 = arith.minsi %142, %c999_i32_66 : i32
      %c0_i32_67 = arith.constant 0 : i32
      %144 = tpu.memref_slice %arg7[%143, %c0_i32_67] : memref<1000x128xf32, #tpu.memory_space<any>> -> memref<1x128xf32, #tpu.memory_space<any>>
      %c0_i32_68 = arith.constant 0 : i32
      %145 = tpu.memref_slice %arg9[%76, %c6_i32, %c0_i32_68] : memref<2x8x128xf32, #tpu.memory_space<vmem>> -> memref<1x1x128xf32, #tpu.memory_space<vmem>>
      %146 = tpu.memref_squeeze %145 : memref<1x1x128xf32, #tpu.memory_space<vmem>> -> memref<1x128xf32, #tpu.memory_space<vmem>>
      %147 = tpu.memref_slice %arg10[%76] : memref<2x!tpu.dma_semaphore, #tpu.memory_space<semaphore_mem>> -> memref<1x!tpu.dma_semaphore, #tpu.memory_space<semaphore_mem>>
      %148 = tpu.memref_squeeze %147 : memref<1x!tpu.dma_semaphore, #tpu.memory_space<semaphore_mem>> -> memref<!tpu.dma_semaphore, #tpu.memory_space<semaphore_mem>>
      tpu.enqueue_dma source(%144 : memref<1x128xf32, #tpu.memory_space<any>>) target(%146 : memref<1x128xf32, #tpu.memory_space<vmem>>) target_semaphore(%148 : memref<!tpu.dma_semaphore, #tpu.memory_space<semaphore_mem>>)
      %c7_i32 = arith.constant 7 : i32
      %149 = arith.addi %78, %c7_i32 : i32
      %150 = arith.index_cast %149 : i32 to index
      %151 = memref.load %arg2[%150] : memref<64xi32, #tpu.memory_space<smem>>
      %c0_i32_69 = arith.constant 0 : i32
      %152 = arith.maxsi %151, %c0_i32_69 : i32
      %c999_i32_70 = arith.constant 999 : i32
      %153 = arith.minsi %152, %c999_i32_70 : i32
      %c0_i32_71 = arith.constant 0 : i32
      %154 = tpu.memref_slice %arg7[%153, %c0_i32_71] : memref<1000x128xf32, #tpu.memory_space<any>> -> memref<1x128xf32, #tpu.memory_space<any>>
      %c0_i32_72 = arith.constant 0 : i32
      %155 = tpu.memref_slice %arg9[%76, %c7_i32, %c0_i32_72] : memref<2x8x128xf32, #tpu.memory_space<vmem>> -> memref<1x1x128xf32, #tpu.memory_space<vmem>>
      %156 = tpu.memref_squeeze %155 : memref<1x1x128xf32, #tpu.memory_space<vmem>> -> memref<1x128xf32, #tpu.memory_space<vmem>>
      %157 = tpu.memref_slice %arg10[%76] : memref<2x!tpu.dma_semaphore, #tpu.memory_space<semaphore_mem>> -> memref<1x!tpu.dma_semaphore, #tpu.memory_space<semaphore_mem>>
      %158 = tpu.memref_squeeze %157 : memref<1x!tpu.dma_semaphore, #tpu.memory_space<semaphore_mem>> -> memref<!tpu.dma_semaphore, #tpu.memory_space<semaphore_mem>>
      tpu.enqueue_dma source(%154 : memref<1x128xf32, #tpu.memory_space<any>>) target(%156 : memref<1x128xf32, #tpu.memory_space<vmem>>) target_semaphore(%158 : memref<!tpu.dma_semaphore, #tpu.memory_space<semaphore_mem>>)
      %c8_i32_73 = arith.constant 8 : i32
    } else {
    }
    %c0_i32_8 = arith.constant 0 : i32
    %c0_i32_9 = arith.constant 0 : i32
    %19 = tpu.memref_slice %arg7[%c0_i32_8, %c0_i32_9] : memref<1000x128xf32, #tpu.memory_space<any>> -> memref<8x128xf32, #tpu.memory_space<any>>
    %c0_i32_10 = arith.constant 0 : i32
    %c0_i32_11 = arith.constant 0 : i32
    %20 = tpu.memref_slice %arg9[%11, %c0_i32_10, %c0_i32_11] : memref<2x8x128xf32, #tpu.memory_space<vmem>> -> memref<1x8x128xf32, #tpu.memory_space<vmem>>
    %21 = tpu.memref_squeeze %20 : memref<1x8x128xf32, #tpu.memory_space<vmem>> -> memref<8x128xf32, #tpu.memory_space<vmem>>
    %22 = tpu.memref_slice %arg10[%11] : memref<2x!tpu.dma_semaphore, #tpu.memory_space<semaphore_mem>> -> memref<1x!tpu.dma_semaphore, #tpu.memory_space<semaphore_mem>>
    %23 = tpu.memref_squeeze %22 : memref<1x!tpu.dma_semaphore, #tpu.memory_space<semaphore_mem>> -> memref<!tpu.dma_semaphore, #tpu.memory_space<semaphore_mem>>
    tpu.wait_dma2 semaphore(%23 : memref<!tpu.dma_semaphore, #tpu.memory_space<semaphore_mem>>) src(%19 : memref<8x128xf32, #tpu.memory_space<any>>) dst(%21 : memref<8x128xf32, #tpu.memory_space<vmem>>)
    %24 = arith.index_cast %11 : i32 to index
    %c0 = arith.constant 0 : index
    %c0_12 = arith.constant 0 : index
    %25 = vector.load %arg9[%24, %c0, %c0_12] : memref<2x8x128xf32, #tpu.memory_space<vmem>>, vector<1x8x128xf32>
    %26 = vector.shape_cast %25 : vector<1x8x128xf32> to vector<8x128xf32>
    %c0_13 = arith.constant 0 : index
    %c0_14 = arith.constant 0 : index
    %27 = vector.load %arg4[%c0_13, %c0_14] : memref<8x128xf32, #tpu.memory_space<vmem>>, vector<8x128xf32>
    %28 = arith.addf %26, %27 : vector<8x128xf32>
    %c0_15 = arith.constant 0 : index
    %c0_16 = arith.constant 0 : index
    %29 = vector.load %arg5[%c0_15, %c0_16] : memref<2x128xf32, #tpu.memory_space<vmem>>, vector<1x128xf32>
    %c1 = arith.constant 1 : index
    %c0_17 = arith.constant 0 : index
    %30 = vector.load %arg5[%c1, %c0_17] : memref<2x128xf32, #tpu.memory_space<vmem>>, vector<1x128xf32>
    %c0_18 = arith.constant 0 : index
    %c0_19 = arith.constant 0 : index
    %31 = vector.load %arg3[%c0_18, %c0_19] : memref<8x1xi32, #tpu.memory_space<vmem>>, vector<8x1xi32>
    %32 = arith.sitofp %31 : vector<8x1xi32> to vector<8x1xf32>
    %33 = arith.subf %30, %29 : vector<1x128xf32>
    %34 = vector.broadcast %32 : vector<8x1xf32> to vector<8x128xf32>
    %35 = vector.broadcast %33 : vector<1x128xf32> to vector<8x128xf32>
    %36 = arith.mulf %34, %35 : vector<8x128xf32>
    %37 = vector.broadcast %29 : vector<1x128xf32> to vector<8x128xf32>
    %38 = arith.addf %37, %36 : vector<8x128xf32>
    %39 = arith.addf %28, %38 : vector<8x128xf32>
    %cst = arith.constant dense<0.000000e+00> : vector<8xf32>
    %40 = vector.multi_reduction <add>, %39, %cst [1] : vector<8x128xf32> to vector<8xf32>
    %41 = vector.shape_cast %40 : vector<8xf32> to vector<8x1xf32>
    %cst_20 = arith.constant 1.280000e+02 : f32
    %42 = vector.broadcast %cst_20 : f32 to vector<8x1xf32>
    %43 = arith.divf %41, %42 : vector<8x1xf32>
    %44 = arith.mulf %39, %39 : vector<8x128xf32>
    %cst_21 = arith.constant dense<0.000000e+00> : vector<8xf32>
    %45 = vector.multi_reduction <add>, %44, %cst_21 [1] : vector<8x128xf32> to vector<8xf32>
    %46 = vector.shape_cast %45 : vector<8xf32> to vector<8x1xf32>
    %cst_22 = arith.constant 1.280000e+02 : f32
    %47 = vector.broadcast %cst_22 : f32 to vector<8x1xf32>
    %48 = arith.divf %46, %47 : vector<8x1xf32>
    %49 = arith.mulf %43, %43 : vector<8x1xf32>
    %50 = arith.subf %48, %49 : vector<8x1xf32>
    %51 = vector.broadcast %43 : vector<8x1xf32> to vector<8x128xf32>
    %52 = arith.subf %39, %51 : vector<8x128xf32>
    %cst_23 = arith.constant 9.99999996E-13 : f32
    %53 = vector.broadcast %cst_23 : f32 to vector<8x1xf32>
    %54 = arith.addf %50, %53 : vector<8x1xf32>
    %55 = math.rsqrt %54 : vector<8x1xf32>
    %56 = vector.broadcast %55 : vector<8x1xf32> to vector<8x128xf32>
    %57 = arith.mulf %52, %56 : vector<8x128xf32>
    %c0_24 = arith.constant 0 : index
    %c0_25 = arith.constant 0 : index
    %58 = vector.load %arg6[%c0_24, %c0_25] : memref<2x128xf32, #tpu.memory_space<vmem>>, vector<1x128xf32>
    %59 = vector.broadcast %58 : vector<1x128xf32> to vector<8x128xf32>
    %60 = arith.mulf %57, %59 : vector<8x128xf32>
    %c1_26 = arith.constant 1 : index
    %c0_27 = arith.constant 0 : index
    %61 = vector.load %arg6[%c1_26, %c0_27] : memref<2x128xf32, #tpu.memory_space<vmem>>, vector<1x128xf32>
    %62 = vector.broadcast %61 : vector<1x128xf32> to vector<8x128xf32>
    %63 = arith.addf %60, %62 : vector<8x128xf32>
    %c0_28 = arith.constant 0 : index
    %c0_29 = arith.constant 0 : index
    %64 = vector.load %arg8[%c0_28, %c0_29] : memref<8x128xf32, #tpu.memory_space<vmem>>, vector<8x128xf32>
    tpu.vector_store %arg8[%c0_28, %c0_29], %63 {strides = array<i32>} : memref<8x128xf32, #tpu.memory_space<vmem>>, vector<8x128xf32>,
    return
  }
  func.func @transform_0(%arg0: i32, %arg1: i32, %arg2: memref<64xi32, #tpu.memory_space<smem>>) -> (i32, i32) {
    %c4_i32 = arith.constant 4 : i32
    %0 = arith.muli %arg0, %c4_i32 : i32
    %1 = arith.addi %0, %arg1 : i32
    %c0_i32 = arith.constant 0 : i32
    %c0_i32_0 = arith.constant 0 : i32
    return %1, %c0_i32 : i32, i32
  }
  func.func @transform_1(%arg0: i32, %arg1: i32, %arg2: memref<64xi32, #tpu.memory_space<smem>>) -> (i32, i32) {
    %c0_i32 = arith.constant 0 : i32
    %c0_i32_0 = arith.constant 0 : i32
    return %arg1, %c0_i32 : i32, i32
  }
  func.func @transform_2(%arg0: i32, %arg1: i32, %arg2: memref<64xi32, #tpu.memory_space<smem>>) -> (i32, i32) {
    %c0_i32 = arith.constant 0 : i32
    %c0_i32_0 = arith.constant 0 : i32
    %c0_i32_1 = arith.constant 0 : i32
    return %c0_i32, %c0_i32_0 : i32, i32
  }
  func.func @transform_3(%arg0: i32, %arg1: i32, %arg2: memref<64xi32, #tpu.memory_space<smem>>) -> (i32, i32) {
    %c0_i32 = arith.constant 0 : i32
    %c0_i32_0 = arith.constant 0 : i32
    %c0_i32_1 = arith.constant 0 : i32
    return %c0_i32, %c0_i32_0 : i32, i32
  }
  func.func @transform_5(%arg0: i32, %arg1: i32, %arg2: memref<64xi32, #tpu.memory_space<smem>>) -> (i32, i32) {
    %c4_i32 = arith.constant 4 : i32
    %0 = arith.muli %arg0, %c4_i32 : i32
    %1 = arith.addi %0, %arg1 : i32
    %c0_i32 = arith.constant 0 : i32
    %c0_i32_0 = arith.constant 0 : i32
    return %1, %c0_i32 : i32, i32
  }
}

</mosaic_0001>

<bundles_post_ra>
// kernel: tpu_custom_call.1
= control target key start
LH: loop header
LB: loop body
LE: loop exit
PB: predicated region body
PF: predicated region fallthrough
CT: control target
= control target key end

     0   :  { %s2474_s0 = inlined_call_operand.vmem [shape: s32[64], index: 0, kind: input, shape index: {}]   ;;  %s2475_s1 = inlined_call_operand.vmem [shape: s32[64,1], index: 1, kind: input, shape index: {}]   ;;  %s2476_s2 = inlined_call_operand.vmem [shape: f32[32,128], index: 2, kind: input, shape index: {}]   ;;  %s2477_s3 = inlined_call_operand.vmem [shape: f32[2,128], index: 3, kind: input, shape index: {}]   ;;  %s2478_s4 = inlined_call_operand.vmem [shape: f32[2,128], index: 4, kind: input, shape index: {}]   ;;  %s2479_s5 = inlined_call_operand.hbm [shape: f32[1000,128], index: 5, kind: input, shape index: {}]   ;;  %s2480_s6 = inlined_call_operand.hbm [shape: f32[64,128], index: 6, kind: output, shape index: {}]  }
   0x1   :  { %2494 = sst [smem:[#allocation70_spill]] %s2475_s1  ;;  %s11_s23 = sshll.u32 %s2474_s0, 4  ;;  %s12_s23 = int_to_ptr.vmem [resolvable:$true] %s11_s23 }
   0x2   :  { %2495 = sst [smem:[#allocation71_spill]] %s2476_s2  ;;  %s1151_s24 = scalar_lea.vmem %s12_s23, 16 }
   0x3   :  { %2496 = sst [smem:[#allocation72_spill]] %s2478_s4  ;;  %p1152_p0 = scmp.ne.s32.totalorder %s12_s23, %s1151_s24 }
   0x4   :  { %2497 = sst [smem:[#allocation73_spill]] %s2480_s6  ;;  %p1156_p1 = scmp.lt.s32.totalorder %s12_s23, %s12_s23 }
   0x5   :  { %p1157_p2 = scmp.lt.s32.totalorder %s1151_s24, %s1151_s24 }
   0x7   :  { %p1158_p3 = por %p1157_p2, %p1156_p1 }
   0x9   :  { %p1159_p4 = pnand %p1158_p3, %p1152_p0 }
   0xb   :  { %1162 = shalt.err (!%p1159_p4)  }
   0xc   :  { %s1711_s25 = smov [#allocation5]  }
   0xd   :  { %14 = dma.vmem_to_smem %s12_s23, 16, %s1711_s25, [#allocation4] }
   0xe   :  { %1671 = dma.done.wait [#allocation4], 16 }
   0xf   :  { %1672 = vsyncadd [#allocation4], 4294967280 }
  0x10   :  { %16 = sfence }
  0x11   :  { %17 = vsyncpa [#allocation7], 0 }
  0x12   :  { %19 = vsyncpa [#allocation7 + $0x1], 0  ;;  %s1760_s26 = smov 0   ;;  %s1762_s27 = smov 0  }
  0x13   :  { %s1764_s0 = smov 0   ;;  %s1766_s28 = smov 0  }
  0x14   :  { %s1768_s29 = smov 0   ;;  %s1770_s30 = smov 0  }
  0x15   :  { %s1772_s7 = smov 0   ;;  %s1774_s8 = smov 0  }
  0x16 LB: > { %2498 = sst [smem:[#allocation61_spill]] %s1681_s26  ;;  %s843_s9 = sadd.s32 4294967295, %s1709_s8   ;;  %s1709_s8 = sphi %s1774_s8, %s25_s8   ;;  %s1705_s7 = sphi %s1772_s7, %s2575_s7   ;;  %s1701_s30 = sphi %s1770_s30, %s2574_s30   ;;  %s1697_s29 = sphi %s1768_s29, %s2573_s29   ;;  %s1693_s28 = sphi %s1766_s28, %s2572_s28   ;;  %s1689_s0 = sphi %s1764_s0, %s2571_s0   ;;  %s1685_s27 = sphi %s1762_s27, %s2577_s27   ;;  %s1681_s26 = sphi %s1760_s26, %s2576_s26  }
  0x17   : > { %2499 = sst [smem:[#allocation62_spill]] %s1689_s0  ;;  %s34_s10 = sadd.s32 1, %s1701_s30 }
  0x18   : > { %2500 = sst [smem:[#allocation63_spill]] %s1701_s30  ;;  %s37_s11 = sadd.s32 1, %s1705_s7 }
  0x19   : > { %2501 = sst [smem:[#allocation64_spill]] %s1705_s7  ;;  %p35_p5 = scmp.ge.s32.totalorder %s34_s10, 4 }
  0x1a   : > { %2502 = sst [smem:[#allocation65_spill]] %s1709_s8  ;;  %s847_s12 = sshll.u32 %s1705_s7, 2 }
  0x1b   : > { %s844_s13 = sadd.s32 4294967294, %s1709_s8   ;;  %s140_s14 = sadd.s32 %s1701_s30, %s847_s12 }
  0x1c   : > { %s2579_s10 = smov (%p35_p5, %s34_s10), 0  ;;  %s2581_s11 = smov (!%p35_p5, %s37_s11), %s1705_s7 }
  0x1d   : > { %2503 = sst [smem:[#allocation66_spill]] %s2579_s10  ;;  %p156_p6 = scmp.ne.s32.totalorder %s1689_s0, %s1685_s27 }
  0x1e   : > { %p157_p7 = scmp.eq.s32.totalorder %s843_s9, 7  ;;  %p39_p8 = scmp.ge.s32.totalorder %s2581_s11, 2 }
  0x1f   : > { %p162_p9 = scmp.ne.s32.totalorder %s1685_s27, %s1681_s26  ;;  %p163_p11 = scmp.eq.s32.totalorder %s844_s13, 7 }
  0x20   : > { %p1813_p10 = por %p157_p7, %p156_p6  ;;  %s2583_s11 = smov (%p39_p8, %s2581_s11), 0 }
  0x21   : > { %2505 = sst [smem:[#allocation67_spill]] %s2583_s11  ;;  %p1819_p12 = por %p163_p11, %p162_p9 }
  0x22   : > { %s2504_s15 = scalar_select %p1813_p10, 1, 0 }
  0x23   : > { %s2506_s16 = scalar_select %p1819_p12, 1, 0 }
  0x24   : > { %p851_p13 = scmp.ge.s32.totalorder %s1709_s8, 1  ;;  %s848_s17 = sshll.u32 %s2583_s11, 2 }
  0x25   : > { %2507 = sst [smem:[#allocation68_spill]] %s2506_s16  ;;  %p205_p0 = scmp.lt.s32.totalorder %s1709_s8, 9 }
  0x26   : > { %s142_s18 = sadd.s32 %s848_s17, %s2579_s10  ;;  %s146_s19 = sadd.s32 1, %s1689_s0 }
  0x27   : > { %s143_s20 = ssub.s32 %s140_s14, %s142_s18  ;;  %p206_p1 = pnand %p851_p13, %p205_p0 }
  0x28   : > { %p144_p2 = scmp.eq.s32.totalorder %s143_s20, 0  ;;  %s2481_s22 = sand.u32 (!%p206_p1), 1, %s1685_s27  }
  0x29   : > { %209 = sbr.rel (%p206_p1) target bundleno = 859 (0x35b), region = 36  ;;  %s853_s23 = sshll.u32 (!%p206_p1), %s1697_s29, 2 }
  0x2a   : > { %s1829_s21 = scalar_select %p144_p2, %s1689_s0, %s146_s19  }
  0x2b   : > { %s1835_s24 = sshll.u32 (!%p206_p1), %s2481_s22, 3  ;;  %s1838_s25 = sadd.s32 (!%p206_p1), %s1693_s28, %s853_s23 }
  0x2c   : > { %2508 = sst [smem:[#allocation69_spill]] %s1829_s21  ;;  %p238_p3 = scmp.lt.s32.totalorder (!%p206_p1), %s1838_s25, 7 }
  0x2d   : > { %p244_p4 = scmp.lt.s32.totalorder (!%p206_p1), %s1693_s28, 3  ;;  %p252_p5 = scmp.lt.s32.totalorder (!%p206_p1), %s1693_s28, 0 }
  0x2e   : > { %s253_s14 = ssub.s32 (!%p206_p1), 0, %s1693_s28  ;;  %s2509_s1 = sld [smem:[#allocation70_spill]] (!%p206_p1) }
  0x2f   : > { %s2510_s2 = sld [smem:[#allocation71_spill]] (!%p206_p1)  ;;  %s857_s11 = smin.u32 (!%p206_p1), %s1693_s28, %s253_s14 }
  0x30   : > { %s239_s9 = scalar_select %p238_p3, %s1838_s25, 7 }
  0x31   : > { %s245_s12 = scalar_select %p244_p4, %s1693_s28, 3 }
  0x32   : > { %s854_s13 = sshll.u32 %s239_s9, 3  ;;  %s255_s10 = sand.u32 1, %s857_s11  }
  0x33   : > { %s855_s19 = sshll.u32 %s245_s12, 3  ;;  %s256_s7 = ssub.s32 0, %s255_s10 }
  0x34   : > { %s1849_s18 = scalar_lea.vmem %s2509_s1, %s854_s13  ;;  %p1071_p6 = scmp.eq.s32.totalorder %s1693_s28, 0 }
  0x35   : > { %s1854_s22 = scalar_lea.vmem %s2510_s2, %s855_s19  ;;  %s2585_s7 = smov (!%p252_p5, %s256_s7), %s255_s10 }
  0x36   : > { %s1859_s9 = sshll.u32 %s1838_s25, 3  ;;  %p859_p7 = scmp.lt.s32.totalorder %s2585_s7, 0 }
  0x37   : > { %s262_s13 = sadd.s32 2, %s2585_s7  ;;  %s287_s14 = sadd.s32 1, %s1859_s9 }
  0x38   : > { %s1016_s12 = scalar_select %p1071_p6, [#allocation5], [#allocation42] }
  0x39   : > { %s2587_s13 = smov (!%p859_p7, %s262_s13), %s2585_s7  ;;  %s1712_s29 = smov [#allocation2]  }
  0x3a   : > { %s1017_s17 = scalar_select %p1071_p6, %s1859_s9, 0 }
  0x3b   : > { %s283_s19 = sshll.u32 %s1712_s29, 4  ;;  %s2589_s14 = smov (!%p1071_p6, %s287_s14), 0  ;;  %s1873_s19 = int_to_ptr.vmem [resolvable:$true] %s283_s19 }
  0x3c   : > { %s269_s11 = sld [smem:[%s1016_s12 + %s1017_s17]]  ;;  %s307_s23 = sadd.s32 2, %s1859_s9 }
  0x3d   : > { %s1019_s10 = scalar_select %p1071_p6, [#allocation5], [#allocation43] }
  0x3e   : > { %s1713_s7 = smov [#allocation2 + $0x1]   ;;  %s2593_s23 = smov (!%p1071_p6, %s307_s23), 0 }
  0x3f   : > { %s1875_s20 = sld [smem:[%s1019_s10 + %s2589_s14]]  ;;  %s1878_s1 = sshll.u32 %s1713_s7, 4  ;;  %s304_s1 = int_to_ptr.vmem [resolvable:$true] %s1878_s1 }
  0x40   : > { %s1022_s12 = scalar_select %p1071_p6, [#allocation5], [#allocation44] }
  0x41   : > { %s1714_s7 = smov [#allocation2 + $0x2]   ;;  %s1896_s26 = scalar_lea.hbm %s2479_s5, 16000 }
  0x42   : > { %p270_p8 = scmp.gt.s32.totalorder %s269_s11, 0  ;;  %p862_p9 = scmp.lt.s32.totalorder %s269_s11, 999 }
  0x43   : > { %s1886_s14 = sld [smem:[%s1022_s12 + %s2593_s23]]  ;;  %s323_s30 = sshll.u32 %s1714_s7, 4  ;;  %s1919_s30 = int_to_ptr.vmem [resolvable:$true] %s323_s30 }
  0x44   : > { %s2591_s11 = smov (!%p270_p8, %s269_s11), 0 }
  0x45   : > { %s2595_s11 = smov (!%p862_p9, %s2591_s11), 999 }
  0x46   : > { %s867_s17 = sshll.u32 %s2595_s11, 4 }
  0x47   : > { %s275_s2 = scalar_lea.hbm %s2479_s5, %s867_s17 }
  0x48   : > { %s1163_s21 = scalar_lea.hbm %s275_s2, 16  ;;  %p1168_p3 = scmp.lt.u32.totalorder %s275_s2, %s2479_s5 }
  0x49   : > { %p1164_p0 = scmp.ne.s32.totalorder %s275_s2, %s1163_s21  ;;  %p1169_p4 = scmp.lt.u32.totalorder %s1896_s26, %s1163_s21 }
  0x4a   : > { %p1171_p7 = scmp.lt.u32.totalorder %s1163_s21, %s275_s2 }
  0x4b   : > { %p1165_p1 = pnand %p1164_p0, %p1071_p6  ;;  %p1170_p5 = por %p1169_p4, %p1168_p3 }
  0x4d   : > { %p1166_p2 = pneg %p1165_p1  ;;  %p1172_p8 = por %p1171_p7, %p1170_p5 }
  0x4f   : > { %p1173_p9 = pnand %p1172_p8, %p1166_p2 }
  0x51   : > { %1176 = shalt.err (!%p1173_p9)  }
  0x52   : > { %s1177_s23 = scalar_lea.vmem %s1873_s19, 16  ;;  %s1907_s0 = scalar_lea.vmem %s1873_s19, 256 }
  0x53   : > { %p1178_p0 = scmp.ne.s32.totalorder %s1873_s19, %s1177_s23  ;;  %p1184_p11 = scmp.lt.s32.totalorder %s1873_s19, %s1873_s19 }
  0x54   : > { %p1185_p3 = scmp.lt.s32.totalorder %s1907_s0, %s1177_s23 }
  0x55   : > { %p1179_p1 = pnand %p1178_p0, %p1071_p6 }
  0x56   : > { %p1186_p4 = por %p1185_p3, %p1184_p11 }
  0x57   : > { %p1180_p13 = pneg %p1179_p1 }
  0x59   : > { %p1187_p5 = pnand %p1186_p4, %p1180_p13 }
  0x5b   : > { %1190 = shalt.err (!%p1187_p5)  }
  0x5c   : > { %1018 = dma.hbm_to_vmem [thread:$0]  (%p1071_p6), %s275_s2, 16, %s1873_s19, [#allocation3] }
  0x5d   : > { %p2511_p2 = scmp.gt.s32.totalorder %s1875_s20, 0  ;;  %p2512_p11 = scmp.lt.s32.totalorder %s1875_s20, 999 }
  0x5e   : > { %s327_s16 = sadd.s32 3, %s1859_s9 }
  0x5f   : > { %s290_s8 = scalar_select %p2511_p2, %s1875_s20, 0 }
  0x61   : > { %s2597_s8 = smov (!%p2512_p11, %s290_s8), 999 }
  0x62   : > { %s873_s21 = sshll.u32 %s2597_s8, 4 }
  0x63   : > { %s294_s29 = scalar_lea.hbm %s2479_s5, %s873_s21 }
  0x64   : > { %s1191_s10 = scalar_lea.hbm %s294_s29, 16  ;;  %p1196_p1 = scmp.lt.u32.totalorder %s294_s29, %s2479_s5 }
  0x65   : > { %p1192_p8 = scmp.ne.s32.totalorder %s294_s29, %s1191_s10  ;;  %p1197_p3 = scmp.lt.u32.totalorder %s1896_s26, %s1191_s10 }
  0x66   : > { %p1199_p5 = scmp.lt.u32.totalorder %s1191_s10, %s294_s29 }
  0x67   : > { %p1193_p9 = pnand %p1192_p8, %p1071_p6  ;;  %p1198_p4 = por %p1197_p3, %p1196_p1 }
  0x69   : > { %p1194_p0 = pneg %p1193_p9  ;;  %p1200_p2 = por %p1199_p5, %p1198_p4 }
  0x6b   : > { %p1201_p11 = pnand %p1200_p2, %p1194_p0 }
  0x6d   : > { %1204 = shalt.err (!%p1201_p11)  }
  0x6e   : > { %s1205_s20 = scalar_lea.vmem %s304_s1, 16  ;;  %p1212_p8 = scmp.lt.s32.totalorder %s304_s1, %s1873_s19 }
  0x6f   : > { %p1206_p7 = scmp.ne.s32.totalorder %s304_s1, %s1205_s20  ;;  %p1213_p9 = scmp.lt.s32.totalorder %s1907_s0, %s1205_s20 }
  0x71   : > { %p1207_p13 = pnand %p1206_p7, %p1071_p6  ;;  %p1214_p10 = por %p1213_p9, %p1212_p8 }
  0x73   : > { %p1208_p12 = pneg %p1207_p13 }
  0x75   : > { %p1215_p1 = pnand %p1214_p10, %p1208_p12 }
  0x77   : > { %1218 = shalt.err (!%p1215_p1)  }
  0x78   : > { %1021 = dma.hbm_to_vmem [thread:$0]  (%p1071_p6), %s294_s29, 16, %s304_s1, [#allocation3] }
  0x79   : > { %p2513_p0 = scmp.gt.s32.totalorder %s1886_s14, 0  ;;  %p2514_p13 = scmp.lt.s32.totalorder %s1886_s14, 999 }
  0x7a   : > { %s1025_s23 = scalar_select %p1071_p6, [#allocation5], [#allocation45] }
  0x7b   : > { %s310_s11 = scalar_select %p2513_p0, %s1886_s14, 0 }
  0x7c   : > { %s2601_s16 = smov (!%p1071_p6, %s327_s16), 0  ;;  %s1715_s21 = smov [#allocation2 + $0x3]  }
  0x7d   : > { %s2599_s11 = smov (!%p2514_p13, %s310_s11), 999  ;;  %s343_s12 = sshll.u32 %s1715_s21, 4  ;;  %s1976_s12 = int_to_ptr.vmem [resolvable:$true] %s343_s12 }
  0x7e   : > { %s879_s8 = sshll.u32 %s2599_s11, 4  ;;  %s1953_s7 = sld [smem:[%s1025_s23 + %s2601_s16]] }
  0x7f   : > { %s314_s2 = scalar_lea.hbm %s2479_s5, %s879_s8 }
  0x80   : > { %s1219_s20 = scalar_lea.hbm %s314_s2, 16  ;;  %p1224_p3 = scmp.lt.u32.totalorder %s314_s2, %s2479_s5 }
  0x81   : > { %p1220_p10 = scmp.ne.s32.totalorder %s314_s2, %s1219_s20  ;;  %p1225_p4 = scmp.lt.u32.totalorder %s1896_s26, %s1219_s20 }
  0x82   : > { %p1227_p2 = scmp.lt.u32.totalorder %s1219_s20, %s314_s2 }
  0x83   : > { %p1221_p12 = pnand %p1220_p10, %p1071_p6  ;;  %p1226_p5 = por %p1225_p4, %p1224_p3 }
  0x85   : > { %p1222_p7 = pneg %p1221_p12  ;;  %p1228_p11 = por %p1227_p2, %p1226_p5 }
  0x87   : > { %p1229_p8 = pnand %p1228_p11, %p1222_p7 }
  0x89   : > { %1232 = shalt.err (!%p1229_p8)  }
  0x8a   : > { %s1233_s14 = scalar_lea.vmem %s1919_s30, 16  ;;  %p1240_p13 = scmp.lt.s32.totalorder %s1919_s30, %s1873_s19 }
  0x8b   : > { %p1234_p9 = scmp.ne.s32.totalorder %s1919_s30, %s1233_s14  ;;  %p1241_p10 = scmp.lt.s32.totalorder %s1907_s0, %s1233_s14 }
  0x8d   : > { %p1235_p1 = pnand %p1234_p9, %p1071_p6  ;;  %p1242_p12 = por %p1241_p10, %p1240_p13 }
  0x8f   : > { %p1236_p0 = pneg %p1235_p1 }
  0x91   : > { %p1243_p3 = pnand %p1242_p12, %p1236_p0 }
  0x93   : > { %1246 = shalt.err (!%p1243_p3)  }
  0x94   : > { %1024 = dma.hbm_to_vmem [thread:$0]  (%p1071_p6), %s314_s2, 16, %s1919_s30, [#allocation3] }
  0x95   : > { %s347_s16 = sadd.s32 4, %s1859_s9  ;;  %s1716_s23 = smov [#allocation2 + $0x4]  }
  0x96   : > { %s1028_s11 = scalar_select %p1071_p6, [#allocation5], [#allocation46] }
  0x97   : > { %s2603_s16 = smov (!%p1071_p6, %s347_s16), 0  ;;  %s1978_s8 = sshll.u32 %s1716_s23, 4  ;;  %s364_s8 = int_to_ptr.vmem [resolvable:$true] %s1978_s8 }
  0x98   : > { %p329_p7 = scmp.gt.s32.totalorder %s1953_s7, 0  ;;  %p880_p4 = scmp.lt.s32.totalorder %s1953_s7, 999 }
  0x99   : > { %s1982_s21 = sld [smem:[%s1028_s11 + %s2603_s16]]  ;;  %s367_s17 = sadd.s32 5, %s1859_s9 }
  0x9a   : > { %s2605_s7 = smov (!%p329_p7, %s1953_s7), 0  ;;  %s2609_s17 = smov (!%p1071_p6, %s367_s17), 0 }
  0x9b   : > { %s1988_s30 = scalar_select %p1071_p6, [#allocation5], [#allocation47] }
  0x9c   : > { %s2607_s7 = smov (!%p880_p4, %s2605_s7), 999 }
  0x9d   : > { %s885_s10 = sshll.u32 %s2607_s7, 4 }
  0x9e   : > { %s334_s1 = scalar_lea.hbm %s2479_s5, %s885_s10 }
  0x9f   : > { %s1247_s29 = scalar_lea.hbm %s334_s1, 16  ;;  %p1252_p9 = scmp.lt.u32.totalorder %s334_s1, %s2479_s5 }
  0xa0   : > { %p1248_p2 = scmp.ne.s32.totalorder %s334_s1, %s1247_s29  ;;  %p1253_p1 = scmp.lt.u32.totalorder %s1896_s26, %s1247_s29 }
  0xa1   : > { %p1255_p13 = scmp.lt.u32.totalorder %s1247_s29, %s334_s1 }
  0xa2   : > { %p1249_p11 = pnand %p1248_p2, %p1071_p6  ;;  %p1254_p0 = por %p1253_p1, %p1252_p9 }
  0xa4   : > { %p1250_p8 = pneg %p1249_p11  ;;  %p1256_p10 = por %p1255_p13, %p1254_p0 }
  0xa6   : > { %p1257_p12 = pnand %p1256_p10, %p1250_p8 }
  0xa8   : > { %1260 = shalt.err (!%p1257_p12)  }
  0xa9   : > { %s1261_s7 = scalar_lea.vmem %s1976_s12, 16  ;;  %p1268_p2 = scmp.lt.s32.totalorder %s1976_s12, %s1873_s19 }
  0xaa   : > { %p1262_p3 = scmp.ne.s32.totalorder %s1976_s12, %s1261_s7  ;;  %p1269_p11 = scmp.lt.s32.totalorder %s1907_s0, %s1261_s7 }
  0xac   : > { %p1263_p7 = pnand %p1262_p3, %p1071_p6  ;;  %p1270_p5 = por %p1269_p11, %p1268_p2 }
  0xae   : > { %p1264_p4 = pneg %p1263_p7 }
  0xb0   : > { %p1271_p1 = pnand %p1270_p5, %p1264_p4 }
  0xb2   : > { %1274 = shalt.err (!%p1271_p1)  }
  0xb3   : > { %1027 = dma.hbm_to_vmem [thread:$0]  (%p1071_p6), %s334_s1, 16, %s1976_s12, [#allocation3] }
  0xb4   : > { %p2515_p8 = scmp.gt.s32.totalorder %s1982_s21, 0  ;;  %p886_p9 = scmp.lt.s32.totalorder %s1982_s21, 999 }
  0xb5   : > { %s2017_s23 = sld [smem:[%s1988_s30 + %s2609_s17]]  ;;  %s1717_s10 = smov [#allocation2 + $0x5]  }
  0xb6   : > { %s350_s11 = scalar_select %p2515_p8, %s1982_s21, 0 }
  0xb7   : > { %s383_s2 = sshll.u32 %s1717_s10, 4  ;;  %s387_s29 = sadd.s32 6, %s1859_s9  ;;  %s2024_s2 = int_to_ptr.vmem [resolvable:$true] %s383_s2 }
  0xb8   : > { %s2611_s11 = smov (!%p886_p9, %s350_s11), 999 }
  0xb9   : > { %s891_s20 = sshll.u32 %s2611_s11, 4 }
  0xba   : > { %s354_s7 = scalar_lea.hbm %s2479_s5, %s891_s20 }
  0xbb   : > { %s1275_s6 = scalar_lea.hbm %s354_s7, 16  ;;  %p1280_p10 = scmp.lt.u32.totalorder %s354_s7, %s2479_s5 }
  0xbc   : > { %p1276_p5 = scmp.ne.s32.totalorder %s354_s7, %s1275_s6  ;;  %p1281_p12 = scmp.lt.u32.totalorder %s1896_s26, %s1275_s6 }
  0xbd   : > { %p1283_p7 = scmp.lt.u32.totalorder %s1275_s6, %s354_s7 }
  0xbe   : > { %p1277_p0 = pnand %p1276_p5, %p1071_p6  ;;  %p1282_p3 = por %p1281_p12, %p1280_p10 }
  0xc0   : > { %p1278_p13 = pneg %p1277_p0  ;;  %p1284_p4 = por %p1283_p7, %p1282_p3 }
  0xc2   : > { %p1285_p2 = pnand %p1284_p4, %p1278_p13 }
  0xc4   : > { %1288 = shalt.err (!%p1285_p2)  }
  0xc5   : > { %s1289_s17 = scalar_lea.vmem %s364_s8, 16  ;;  %p1296_p9 = scmp.lt.s32.totalorder %s364_s8, %s1873_s19 }
  0xc6   : > { %p1290_p11 = scmp.ne.s32.totalorder %s364_s8, %s1289_s17  ;;  %p1297_p5 = scmp.lt.s32.totalorder %s1907_s0, %s1289_s17 }
  0xc8   : > { %p1291_p1 = pnand %p1290_p11, %p1071_p6  ;;  %p1298_p0 = por %p1297_p5, %p1296_p9 }
  0xca   : > { %p1292_p8 = pneg %p1291_p1 }
  0xcc   : > { %p1299_p10 = pnand %p1298_p0, %p1292_p8 }
  0xce   : > { %1302 = shalt.err (!%p1299_p10)  }
  0xcf   : > { %1030 = dma.hbm_to_vmem [thread:$0]  (%p1071_p6), %s354_s7, 16, %s364_s8, [#allocation3] }
  0xd0   : > { %p369_p13 = scmp.gt.s32.totalorder %s2017_s23, 0  ;;  %p892_p12 = scmp.lt.s32.totalorder %s2017_s23, 999 }
  0xd1   : > { %s1034_s6 = scalar_select %p1071_p6, [#allocation5], [#allocation48] }
  0xd2   : > { %s2613_s23 = smov (!%p369_p13, %s2017_s23), 0  ;;  %s2615_s29 = smov (!%p1071_p6, %s387_s29), 0 }
  0xd3   : > { %s2617_s23 = smov (!%p892_p12, %s2613_s23), 999  ;;  %s2045_s30 = sld [smem:[%s1034_s6 + %s2615_s29]] }
  0xd4   : > { %s897_s1 = sshll.u32 %s2617_s23, 4  ;;  %s407_s11 = sadd.s32 7, %s1859_s9 }
  0xd5   : > { %s374_s14 = scalar_lea.hbm %s2479_s5, %s897_s1 }
  0xd6   : > { %s1303_s16 = scalar_lea.hbm %s374_s14, 16  ;;  %p1308_p2 = scmp.lt.u32.totalorder %s374_s14, %s2479_s5 }
  0xd7   : > { %p1304_p3 = scmp.ne.s32.totalorder %s374_s14, %s1303_s16  ;;  %p1309_p11 = scmp.lt.u32.totalorder %s1896_s26, %s1303_s16 }
  0xd8   : > { %p1311_p8 = scmp.lt.u32.totalorder %s1303_s16, %s374_s14 }
  0xd9   : > { %p1305_p7 = pnand %p1304_p3, %p1071_p6  ;;  %p1310_p1 = por %p1309_p11, %p1308_p2 }
  0xdb   : > { %p1306_p4 = pneg %p1305_p7  ;;  %p1312_p9 = por %p1311_p8, %p1310_p1 }
  0xdd   : > { %p1313_p5 = pnand %p1312_p9, %p1306_p4 }
  0xdf   : > { %1316 = shalt.err (!%p1313_p5)  }
  0xe0   : > { %s1317_s23 = scalar_lea.vmem %s2024_s2, 16  ;;  %p1324_p12 = scmp.lt.s32.totalorder %s2024_s2, %s1873_s19 }
  0xe1   : > { %p1318_p0 = scmp.ne.s32.totalorder %s2024_s2, %s1317_s23  ;;  %p1325_p3 = scmp.lt.s32.totalorder %s1907_s0, %s1317_s23 }
  0xe3   : > { %p1319_p10 = pnand %p1318_p0, %p1071_p6  ;;  %p1326_p7 = por %p1325_p3, %p1324_p12 }
  0xe5   : > { %p1320_p13 = pneg %p1319_p10 }
  0xe7   : > { %p1327_p2 = pnand %p1326_p7, %p1320_p13 }
  0xe9   : > { %1330 = shalt.err (!%p1327_p2)  }
  0xea   : > { %1033 = dma.hbm_to_vmem [thread:$0]  (%p1071_p6), %s374_s14, 16, %s2024_s2, [#allocation3] }
  0xeb   : > { %s1037_s29 = scalar_select %p1071_p6, [#allocation5], [#allocation49] }
  0xec   : > { %s2619_s11 = smov (!%p1071_p6, %s407_s11), 0  ;;  %p389_p4 = scmp.gt.s32.totalorder %s2045_s30, 0 }
  0xed   : > { %p898_p11 = scmp.lt.s32.totalorder %s2045_s30, 999  ;;  %s1718_s12 = smov [#allocation2 + $0x6]  }
  0xee   : > { %s403_s21 = sshll.u32 %s1718_s12, 4  ;;  %s2073_s17 = sld [smem:[%s1037_s29 + %s2619_s11]]  ;;  %s404_s21 = int_to_ptr.vmem [resolvable:$true] %s403_s21 }
  0xef   : > { %s2621_s30 = smov (!%p389_p4, %s2045_s30), 0  ;;  %s1719_s6 = smov [#allocation2 + $0x7]  }
  0xf0   : > { %s423_s1 = sshll.u32 %s1719_s6, 4  ;;  %s2077_s10 = sadd.s32 1, %s1693_s28  ;;  %s2079_s1 = int_to_ptr.vmem [resolvable:$true] %s423_s1 }
  0xf1   : > { %s2623_s30 = smov (!%p898_p11, %s2621_s30), 999 }
  0xf2   : > { %s903_s2 = sshll.u32 %s2623_s30, 4 }
  0xf3   : > { %s394_s16 = scalar_lea.hbm %s2479_s5, %s903_s2 }
  0xf4   : > { %s1331_s8 = scalar_lea.hbm %s394_s16, 16  ;;  %p1336_p0 = scmp.lt.u32.totalorder %s394_s16, %s2479_s5 }
  0xf5   : > { %p1332_p8 = scmp.ne.s32.totalorder %s394_s16, %s1331_s8  ;;  %p1337_p10 = scmp.lt.u32.totalorder %s1896_s26, %s1331_s8 }
  0xf6   : > { %p1339_p12 = scmp.lt.u32.totalorder %s1331_s8, %s394_s16 }
  0xf7   : > { %p1333_p9 = pnand %p1332_p8, %p1071_p6  ;;  %p1338_p13 = por %p1337_p10, %p1336_p0 }
  0xf9   : > { %p1334_p5 = pneg %p1333_p9  ;;  %p1340_p3 = por %p1339_p12, %p1338_p13 }
  0xfb   : > { %p1341_p7 = pnand %p1340_p3, %p1334_p5 }
  0xfd   : > { %1344 = shalt.err (!%p1341_p7)  }
  0xfe   : > { %s1345_s30 = scalar_lea.vmem %s404_s21, 16  ;;  %p1352_p8 = scmp.lt.s32.totalorder %s404_s21, %s1873_s19 }
  0xff   : > { %p1346_p2 = scmp.ne.s32.totalorder %s404_s21, %s1345_s30  ;;  %p1353_p9 = scmp.lt.s32.totalorder %s1907_s0, %s1345_s30 }
 0x101   : > { %p1347_p4 = pnand %p1346_p2, %p1071_p6  ;;  %p1354_p1 = por %p1353_p9, %p1352_p8 }
 0x103   : > { %p1348_p11 = pneg %p1347_p4 }
 0x105   : > { %p1355_p0 = pnand %p1354_p1, %p1348_p11 }
 0x107   : > { %1358 = shalt.err (!%p1355_p0)  }
 0x108   : > { %1036 = dma.hbm_to_vmem [thread:$0]  (%p1071_p6), %s394_s16, 16, %s404_s21, [#allocation3] }
 0x109   : > { %p2516_p5 = scmp.gt.s32.totalorder %s2073_s17, 0  ;;  %p904_p10 = scmp.lt.s32.totalorder %s2073_s17, 999 }
 0x10a   : > { %s434_s29 = ssub.s32 0, %s2077_s10  ;;  %s2112_s7 = sadd.s32 8, %s1859_s9 }
 0x10b   : > { %s410_s23 = scalar_select %p2516_p5, %s2073_s17, 0 }
 0x10c   : > { %s2104_s12 = smin.u32 %s434_s29, %s2077_s10 }
 0x10d   : > { %s2625_s23 = smov (!%p904_p10, %s410_s23), 999  ;;  %s436_s6 = sand.u32 1, %s2104_s12  }
 0x10e   : > { %s909_s2 = sshll.u32 %s2625_s23, 4  ;;  %s437_s20 = ssub.s32 0, %s436_s6 }
 0x10f   : > { %s414_s11 = scalar_lea.hbm %s2479_s5, %s909_s2 }
 0x110   : > { %s1359_s21 = scalar_lea.hbm %s414_s11, 16  ;;  %p1364_p2 = scmp.lt.u32.totalorder %s414_s11, %s2479_s5 }
 0x111   : > { %p1360_p12 = scmp.ne.s32.totalorder %s414_s11, %s1359_s21  ;;  %p1365_p4 = scmp.lt.u32.totalorder %s1896_s26, %s1359_s21 }
 0x112   : > { %p1367_p8 = scmp.lt.u32.totalorder %s1359_s21, %s414_s11 }
 0x113   : > { %p1361_p3 = pnand %p1360_p12, %p1071_p6  ;;  %p1366_p11 = por %p1365_p4, %p1364_p2 }
 0x115   : > { %p1362_p7 = pneg %p1361_p3  ;;  %p1368_p9 = por %p1367_p8, %p1366_p11 }
 0x117   : > { %p1369_p0 = pnand %p1368_p9, %p1362_p7 }
 0x119   : > { %1372 = shalt.err (!%p1369_p0)  }
 0x11a   : > { %s1373_s9 = scalar_lea.vmem %s2079_s1, 16  ;;  %p1380_p3 = scmp.lt.s32.totalorder %s2079_s1, %s1873_s19 }
 0x11b   : > { %p1374_p5 = scmp.ne.s32.totalorder %s2079_s1, %s1373_s9  ;;  %p1381_p13 = scmp.lt.s32.totalorder %s1907_s0, %s1373_s9 }
 0x11d   : > { %p1375_p10 = pnand %p1374_p5, %p1071_p6  ;;  %p1382_p1 = por %p1381_p13, %p1380_p3 }
 0x11f   : > { %p1376_p12 = pneg %p1375_p10 }
 0x121   : > { %p1383_p2 = pnand %p1382_p1, %p1376_p12 }
 0x123   : > { %1386 = shalt.err (!%p1383_p2)  }
 0x124   : > { %1039 = dma.hbm_to_vmem [thread:$0]  (%p1071_p6), %s414_s11, 16, %s2079_s1, [#allocation3] }
 0x125   : > { %p2517_p7 = scmp.lt.s32.totalorder %s2077_s10, 0  ;;  %p2518_p4 = scmp.lt.s32.totalorder %s2077_s10, 4 }
 0x126   : > { %s467_s12 = sadd.s32 1, %s2112_s7 }
 0x127   : > { %s2627_s20 = smov (!%p2517_p7, %s437_s20), %s436_s6  ;;  %p2519_p13 = pmov %p2518_p4 }
 0x128   : > { %s1041_s30 = scalar_select %p2518_p4, [#allocation5], [#allocation50] }
 0x129   : > { %p913_p11 = scmp.lt.s32.totalorder %s2627_s20, 0  ;;  %s443_s23 = sadd.s32 2, %s2627_s20 }
 0x12a   : > { %s1042_s29 = scalar_select %p2519_p13, %s2112_s7, 0 }
 0x12b   : > { %s2629_s23 = smov (!%p913_p11, %s443_s23), %s2627_s20  ;;  %p2520_p6 = pmov %p2518_p4 }
 0x12c   : > { %s446_s28 = sld [smem:[%s1041_s30 + %s1042_s29]]  ;;  %s921_s2 = sshll.u32 %s2629_s23, 3 }
 0x12d   : > { %s2140_s21 = scalar_lea.vmem [#allocation2], %s921_s2  ;;  %p2521_p9 = pmov %p2518_p4 }
 0x12e   : > { %s463_s1 = sshll.u32 %s2140_s21, 4  ;;  %s761_s6 = scalar_lea.vmem %s2140_s21, 1 [#allocation2]  ;;  %s2143_s1 = int_to_ptr.vmem [resolvable:$true] %s463_s1 }
 0x12f   : > { %s1044_s11 = scalar_select %p2520_p6, [#allocation5], [#allocation51] }
 0x130   : > { %s2631_s12 = smov (!%p2521_p9, %s467_s12), 0  ;;  %s484_s17 = sshll.u32 %s761_s6, 4  ;;  %s2156_s17 = int_to_ptr.vmem [resolvable:$true] %s484_s17 }
 0x131   : > { %s2150_s20 = sld [smem:[%s1044_s11 + %s2631_s12]]  ;;  %p2522_p0 = pmov %p2518_p4 }
 0x132   : > { %p447_p1 = scmp.gt.s32.totalorder %s446_s28, 0  ;;  %p915_p8 = scmp.lt.s32.totalorder %s446_s28, 999 }
 0x133   : > { %s2154_s16 = scalar_select %p2522_p0, [#allocation5], [#allocation52] }
 0x134   : > { %s2633_s28 = smov (!%p447_p1, %s446_s28), 0  ;;  %s766_s8 = scalar_lea.vmem %s2140_s21, 2 [#allocation2] }
 0x135   : > { %s2635_s28 = smov (!%p915_p8, %s2633_s28), 999  ;;  %s2162_s14 = scalar_lea.sflag [#allocation3], %s2629_s23 }
 0x136   : > { %s920_s9 = sshll.u32 %s2635_s28, 4  ;;  %p2523_p10 = pmov %p2522_p0 }
 0x137   : > { %s452_s2 = scalar_lea.hbm %s2479_s5, %s920_s9 }
 0x138   : > { %s1387_s4 = scalar_lea.hbm %s452_s2, 16  ;;  %p1392_p2 = scmp.lt.u32.totalorder %s452_s2, %s2479_s5 }
 0x139   : > { %p1388_p5 = scmp.ne.s32.totalorder %s452_s2, %s1387_s4  ;;  %p1393_p7 = scmp.lt.u32.totalorder %s1896_s26, %s1387_s4 }
 0x13a   : > { %p1395_p11 = scmp.lt.u32.totalorder %s1387_s4, %s452_s2 }
 0x13b   : > { %p1389_p12 = pnand %p1388_p5, %p2523_p10  ;;  %p1394_p4 = por %p1393_p7, %p1392_p2 }
 0x13d   : > { %p1390_p3 = pneg %p1389_p12  ;;  %p1396_p13 = por %p1395_p11, %p1394_p4 }
 0x13f   : > { %p1397_p6 = pnand %p1396_p13, %p1390_p3 }
 0x141   : > { %1400 = shalt.err (!%p1397_p6)  }
 0x142   : > { %s1401_s23 = scalar_lea.vmem %s2143_s1, 16  ;;  %p2524_p8 = pmov %p2522_p0 }
 0x143   : > { %p1402_p1 = scmp.ne.s32.totalorder %s2143_s1, %s1401_s23  ;;  %p1408_p5 = scmp.lt.s32.totalorder %s2143_s1, %s1873_s19 }
 0x144   : > { %p1409_p10 = scmp.lt.s32.totalorder %s1907_s0, %s1401_s23 }
 0x145   : > { %p1403_p9 = pnand %p1402_p1, %p2524_p8 }
 0x146   : > { %p1410_p12 = por %p1409_p10, %p1408_p5 }
 0x147   : > { %p1404_p0 = pneg %p1403_p9 }
 0x149   : > { %p1411_p2 = pnand %p1410_p12, %p1404_p0 }
 0x14b   : > { %1414 = shalt.err (!%p1411_p2)  }
 0x14c   : > { %p2525_p7 = pmov %p2524_p8  ;;  %p469_p3 = scmp.gt.s32.totalorder %s2150_s20, 0 }
 0x14d   : > { %p922_p4 = scmp.lt.s32.totalorder %s2150_s20, 999  ;;  %s2526_s4 = sadd.s32 2, %s2112_s7 }
 0x14e   : > { %1043 = dma.hbm_to_vmem [thread:$0]  (%p2525_p7), %s452_s2, 16, %s2143_s1, %s2162_s14 }
 0x14f   : > { %p2527_p11 = pmov %p2525_p7  ;;  %s2639_s20 = smov (!%p469_p3, %s2150_s20), 0 }
 0x150   : > { %s505_s11 = sshll.u32 %s766_s8, 4  ;;  %s2641_s20 = smov (!%p922_p4, %s2639_s20), 999  ;;  %s2195_s11 = int_to_ptr.vmem [resolvable:$true] %s505_s11 }
 0x151   : > { %s2637_s4 = smov (!%p2527_p11, %s2526_s4), 0  ;;  %p2528_p13 = pmov %p2525_p7 }
 0x152   : > { %s2189_s28 = sld [smem:[%s2154_s16 + %s2637_s4]]  ;;  %s927_s30 = sshll.u32 %s2641_s20, 4 }
 0x153   : > { %s2193_s9 = scalar_select %p2528_p13, [#allocation5], [#allocation53] }
 0x154   : > { %s474_s1 = scalar_lea.hbm %s2479_s5, %s927_s30  ;;  %s771_s2 = scalar_lea.vmem %s2140_s21, 3 [#allocation2] }
 0x155   : > { %s1415_s6 = scalar_lea.hbm %s474_s1, 16  ;;  %p2529_p1 = pmov %p2525_p7 }
 0x156   : > { %p1416_p6 = scmp.ne.s32.totalorder %s474_s1, %s1415_s6  ;;  %p1420_p0 = scmp.lt.u32.totalorder %s474_s1, %s2479_s5 }
 0x157   : > { %p1421_p5 = scmp.lt.u32.totalorder %s1896_s26, %s1415_s6  ;;  %p1423_p12 = scmp.lt.u32.totalorder %s1415_s6, %s474_s1 }
 0x158   : > { %p1417_p8 = pnand %p1416_p6, %p2529_p1 }
 0x159   : > { %p1422_p10 = por %p1421_p5, %p1420_p0 }
 0x15a   : > { %p1418_p9 = pneg %p1417_p8 }
 0x15b   : > { %p1424_p2 = por %p1423_p12, %p1422_p10 }
 0x15d   : > { %p1425_p7 = pnand %p1424_p2, %p1418_p9 }
 0x15f   : > { %1428 = shalt.err (!%p1425_p7)  }
 0x160   : > { %s1429_s8 = scalar_lea.vmem %s2156_s17, 16  ;;  %p2530_p4 = pmov %p2529_p1 }
 0x161   : > { %p1430_p3 = scmp.ne.s32.totalorder %s2156_s17, %s1429_s8  ;;  %p1436_p6 = scmp.lt.s32.totalorder %s2156_s17, %s1873_s19 }
 0x162   : > { %p1437_p1 = scmp.lt.s32.totalorder %s1907_s0, %s1429_s8 }
 0x163   : > { %p1431_p11 = pnand %p1430_p3, %p2530_p4 }
 0x164   : > { %p1438_p8 = por %p1437_p1, %p1436_p6 }
 0x165   : > { %p1432_p13 = pneg %p1431_p11 }
 0x167   : > { %p1439_p0 = pnand %p1438_p8, %p1432_p13 }
 0x169   : > { %1442 = shalt.err (!%p1439_p0)  }
 0x16a   : > { %p2531_p5 = pmov %p2530_p4  ;;  %p490_p9 = scmp.gt.s32.totalorder %s2189_s28, 0 }
 0x16b   : > { %p929_p10 = scmp.lt.s32.totalorder %s2189_s28, 999  ;;  %s2532_s20 = sadd.s32 3, %s2112_s7 }
 0x16c   : > { %1046 = dma.hbm_to_vmem [thread:$0]  (%p2531_p5), %s474_s1, 16, %s2156_s17, %s2162_s14 }
 0x16d   : > { %p2533_p12 = pmov %p2530_p4  ;;  %s2645_s28 = smov (!%p490_p9, %s2189_s28), 0 }
 0x16e   : > { %s526_s30 = sshll.u32 %s771_s2, 4  ;;  %s2647_s28 = smov (!%p929_p10, %s2645_s28), 999  ;;  %s2236_s30 = int_to_ptr.vmem [resolvable:$true] %s526_s30 }
 0x16f   : > { %s2643_s20 = smov (!%p2533_p12, %s2532_s20), 0  ;;  %p2534_p2 = pmov %p2530_p4 }
 0x170   : > { %s2226_s4 = sld [smem:[%s2193_s9 + %s2643_s20]]  ;;  %s934_s12 = sshll.u32 %s2647_s28, 4 }
 0x171   : > { %s2230_s29 = scalar_select %p2534_p2, [#allocation5], [#allocation54] }
 0x172   : > { %s530_s6 = sadd.s32 4, %s2112_s7  ;;  %s495_s17 = scalar_lea.hbm %s2479_s5, %s934_s12 }
 0x173   : > { %s1443_s1 = scalar_lea.hbm %s495_s17, 16  ;;  %p2535_p3 = pmov %p2534_p2 }
 0x174   : > { %p1444_p7 = scmp.ne.s32.totalorder %s495_s17, %s1443_s1  ;;  %p1448_p13 = scmp.lt.u32.totalorder %s495_s17, %s2479_s5 }
 0x175   : > { %p1449_p6 = scmp.lt.u32.totalorder %s1896_s26, %s1443_s1  ;;  %p1451_p8 = scmp.lt.u32.totalorder %s1443_s1, %s495_s17 }
 0x176   : > { %p1445_p4 = pnand %p1444_p7, %p2535_p3 }
 0x177   : > { %p1450_p1 = por %p1449_p6, %p1448_p13 }
 0x178   : > { %p1446_p11 = pneg %p1445_p4 }
 0x179   : > { %p1452_p0 = por %p1451_p8, %p1450_p1 }
 0x17b   : > { %p1453_p5 = pnand %p1452_p0, %p1446_p11 }
 0x17d   : > { %1456 = shalt.err (!%p1453_p5)  }
 0x17e   : > { %s1457_s28 = scalar_lea.vmem %s2195_s11, 16  ;;  %p2536_p10 = pmov %p2534_p2 }
 0x17f   : > { %p1458_p9 = scmp.ne.s32.totalorder %s2195_s11, %s1457_s28  ;;  %p1464_p7 = scmp.lt.s32.totalorder %s2195_s11, %s1873_s19 }
 0x180   : > { %p1465_p3 = scmp.lt.s32.totalorder %s1907_s0, %s1457_s28 }
 0x181   : > { %p1459_p12 = pnand %p1458_p9, %p2536_p10 }
 0x182   : > { %p1466_p4 = por %p1465_p3, %p1464_p7 }
 0x183   : > { %p1460_p2 = pneg %p1459_p12 }
 0x185   : > { %p1467_p6 = pnand %p1466_p4, %p1460_p2 }
 0x187   : > { %1470 = shalt.err (!%p1467_p6)  }
 0x188   : > { %p2537_p13 = pmov %p2536_p10  ;;  %p511_p11 = scmp.gt.s32.totalorder %s2226_s4, 0 }
 0x189   : > { %p936_p1 = scmp.lt.s32.totalorder %s2226_s4, 999  ;;  %p2538_p8 = pmov %p2536_p10 }
 0x18a   : > { %1049 = dma.hbm_to_vmem [thread:$0]  (%p2537_p13), %s495_s17, 16, %s2195_s11, %s2162_s14 }
 0x18b   : > { %s2649_s6 = smov (!%p2538_p8, %s530_s6), 0  ;;  %s2651_s4 = smov (!%p511_p11, %s2226_s4), 0 }
 0x18c   : > { %s2261_s2 = sld [smem:[%s2230_s29 + %s2649_s6]]  ;;  %s776_s20 = scalar_lea.vmem %s2140_s21, 4 [#allocation2] }
 0x18d   : > { %s2653_s4 = smov (!%p936_p1, %s2651_s4), 999  ;;  %p2539_p0 = pmov %p2538_p8 }
 0x18e   : > { %s941_s16 = sshll.u32 %s2653_s4, 4  ;;  %s551_s23 = sadd.s32 5, %s2112_s7 }
 0x18f   : > { %s2266_s12 = scalar_select %p2539_p0, [#allocation5], [#allocation55] }
 0x190   : > { %s516_s8 = scalar_lea.hbm %s2479_s5, %s941_s16  ;;  %s547_s11 = sshll.u32 %s776_s20, 4  ;;  %s548_s11 = int_to_ptr.vmem [resolvable:$true] %s547_s11 }
 0x191   : > { %s1471_s17 = scalar_lea.hbm %s516_s8, 16  ;;  %p2540_p9 = pmov %p2539_p0 }
 0x192   : > { %p1472_p5 = scmp.ne.s32.totalorder %s516_s8, %s1471_s17  ;;  %p1476_p2 = scmp.lt.u32.totalorder %s516_s8, %s2479_s5 }
 0x193   : > { %p1477_p7 = scmp.lt.u32.totalorder %s1896_s26, %s1471_s17  ;;  %p1479_p4 = scmp.lt.u32.totalorder %s1471_s17, %s516_s8 }
 0x194   : > { %p1473_p10 = pnand %p1472_p5, %p2540_p9 }
 0x195   : > { %p1478_p3 = por %p1477_p7, %p1476_p2 }
 0x196   : > { %p1474_p12 = pneg %p1473_p10 }
 0x197   : > { %p1480_p6 = por %p1479_p4, %p1478_p3 }
 0x199   : > { %p1481_p13 = pnand %p1480_p6, %p1474_p12 }
 0x19b   : > { %1484 = shalt.err (!%p1481_p13)  }
 0x19c   : > { %s1485_s4 = scalar_lea.vmem %s2236_s30, 16  ;;  %p2541_p1 = pmov %p2539_p0 }
 0x19d   : > { %p1486_p11 = scmp.ne.s32.totalorder %s2236_s30, %s1485_s4  ;;  %p1492_p5 = scmp.lt.s32.totalorder %s2236_s30, %s1873_s19 }
 0x19e   : > { %p1493_p9 = scmp.lt.s32.totalorder %s1907_s0, %s1485_s4 }
 0x19f   : > { %p1487_p8 = pnand %p1486_p11, %p2541_p1 }
 0x1a0   : > { %p1494_p10 = por %p1493_p9, %p1492_p5 }
 0x1a1   : > { %p1488_p0 = pneg %p1487_p8 }
 0x1a3   : > { %p1495_p2 = pnand %p1494_p10, %p1488_p0 }
 0x1a5   : > { %1498 = shalt.err (!%p1495_p2)  }
 0x1a6   : > { %p2542_p7 = pmov %p2541_p1  ;;  %p532_p12 = scmp.gt.s32.totalorder %s2261_s2, 0 }
 0x1a7   : > { %p943_p3 = scmp.lt.s32.totalorder %s2261_s2, 999  ;;  %p2543_p4 = pmov %p2541_p1 }
 0x1a8   : > { %1052 = dma.hbm_to_vmem [thread:$0]  (%p2542_p7), %s516_s8, 16, %s2236_s30, %s2162_s14 }
 0x1a9   : > { %s2655_s23 = smov (!%p2543_p4, %s551_s23), 0  ;;  %s2657_s2 = smov (!%p532_p12, %s2261_s2), 0 }
 0x1aa   : > { %s2295_s6 = sld [smem:[%s2266_s12 + %s2655_s23]]  ;;  %s781_s20 = scalar_lea.vmem %s2140_s21, 5 [#allocation2] }
 0x1ab   : > { %s2659_s2 = smov (!%p943_p3, %s2657_s2), 999  ;;  %s2298_s1 = sshll.u32 %s781_s20, 4  ;;  %s569_s1 = int_to_ptr.vmem [resolvable:$true] %s2298_s1 }
 0x1ac   : > { %s948_s16 = sshll.u32 %s2659_s2, 4  ;;  %s572_s29 = sadd.s32 6, %s2112_s7 }
 0x1ad   : > { %s537_s28 = scalar_lea.hbm %s2479_s5, %s948_s16  ;;  %p2544_p13 = pmov %p2541_p1 }
 0x1ae   : > { %s1499_s30 = scalar_lea.hbm %s537_s28, 16  ;;  %p1504_p8 = scmp.lt.u32.totalorder %s537_s28, %s2479_s5 }
 0x1af   : > { %p1500_p6 = scmp.ne.s32.totalorder %s537_s28, %s1499_s30  ;;  %p1505_p0 = scmp.lt.u32.totalorder %s1896_s26, %s1499_s30 }
 0x1b0   : > { %p1507_p9 = scmp.lt.u32.totalorder %s1499_s30, %s537_s28 }
 0x1b1   : > { %p1501_p11 = pnand %p1500_p6, %p2544_p13  ;;  %p1506_p5 = por %p1505_p0, %p1504_p8 }
 0x1b3   : > { %p1502_p1 = pneg %p1501_p11  ;;  %p1508_p10 = por %p1507_p9, %p1506_p5 }
 0x1b5   : > { %p1509_p2 = pnand %p1508_p10, %p1502_p1 }
 0x1b7   : > { %1512 = shalt.err (!%p1509_p2)  }
 0x1b8   : > { %s1513_s2 = scalar_lea.vmem %s548_s11, 16  ;;  %p2545_p12 = pmov %p2543_p4 }
 0x1b9   : > { %p1514_p7 = scmp.ne.s32.totalorder %s548_s11, %s1513_s2  ;;  %p1520_p6 = scmp.lt.s32.totalorder %s548_s11, %s1873_s19 }
 0x1ba   : > { %p1521_p13 = scmp.lt.s32.totalorder %s1907_s0, %s1513_s2 }
 0x1bb   : > { %p1515_p3 = pnand %p1514_p7, %p2545_p12 }
 0x1bc   : > { %p1522_p11 = por %p1521_p13, %p1520_p6 }
 0x1bd   : > { %p1516_p4 = pneg %p1515_p3 }
 0x1bf   : > { %p1523_p0 = pnand %p1522_p11, %p1516_p4 }
 0x1c1   : > { %1526 = shalt.err (!%p1523_p0)  }
 0x1c2   : > { %p2546_p8 = pmov %p2545_p12  ;;  %p553_p1 = scmp.gt.s32.totalorder %s2295_s6, 0 }
 0x1c3   : > { %p950_p5 = scmp.lt.s32.totalorder %s2295_s6, 999  ;;  %s786_s16 = scalar_lea.vmem %s2140_s21, 6 [#allocation2] }
 0x1c4   : > { %1055 = dma.hbm_to_vmem [thread:$0]  (%p2546_p8), %s537_s28, 16, %s548_s11, %s2162_s14 }
 0x1c5   : > { %p2547_p9 = pmov %p2546_p8  ;;  %s2661_s6 = smov (!%p553_p1, %s2295_s6), 0 }
 0x1c6   : > { %p2548_p10 = pmov %p2546_p8  ;;  %s2665_s6 = smov (!%p950_p5, %s2661_s6), 999 }
 0x1c7   : > { %s1059_s12 = scalar_select %p2547_p9, [#allocation5], [#allocation56] }
 0x1c8   : > { %s2663_s29 = smov (!%p2548_p10, %s572_s29), 0  ;;  %s955_s20 = sshll.u32 %s2665_s6, 4 }
 0x1c9   : > { %s2325_s23 = sld [smem:[%s1059_s12 + %s2663_s29]]  ;;  %s558_s30 = scalar_lea.hbm %s2479_s5, %s955_s20 }
 0x1ca   : > { %s593_s8 = sadd.s32 7, %s2112_s7  ;;  %s1527_s11 = scalar_lea.hbm %s558_s30, 16 }
 0x1cb   : > { %p1528_p2 = scmp.ne.s32.totalorder %s558_s30, %s1527_s11  ;;  %p2549_p7 = pmov %p2546_p8 }
 0x1cc   : > { %p1532_p4 = scmp.lt.u32.totalorder %s558_s30, %s2479_s5  ;;  %p1533_p6 = scmp.lt.u32.totalorder %s1896_s26, %s1527_s11 }
 0x1cd   : > { %p1529_p12 = pnand %p1528_p2, %p2549_p7  ;;  %p1535_p11 = scmp.lt.u32.totalorder %s1527_s11, %s558_s30 }
 0x1ce   : > { %p1534_p13 = por %p1533_p6, %p1532_p4 }
 0x1cf   : > { %p1530_p3 = pneg %p1529_p12 }
 0x1d0   : > { %p1536_p0 = por %p1535_p11, %p1534_p13 }
 0x1d2   : > { %p1537_p8 = pnand %p1536_p0, %p1530_p3 }
 0x1d4   : > { %1540 = shalt.err (!%p1537_p8)  }
 0x1d5   : > { %s1541_s6 = scalar_lea.vmem %s569_s1, 16  ;;  %p2550_p5 = pmov %p2549_p7 }
 0x1d6   : > { %p1542_p1 = scmp.ne.s32.totalorder %s569_s1, %s1541_s6  ;;  %p1548_p2 = scmp.lt.s32.totalorder %s569_s1, %s1873_s19 }
 0x1d7   : > { %p1549_p7 = scmp.lt.s32.totalorder %s1907_s0, %s1541_s6 }
 0x1d8   : > { %p1543_p9 = pnand %p1542_p1, %p2550_p5 }
 0x1d9   : > { %p1550_p12 = por %p1549_p7, %p1548_p2 }
 0x1da   : > { %p1544_p10 = pneg %p1543_p9 }
 0x1dc   : > { %p1551_p4 = pnand %p1550_p12, %p1544_p10 }
 0x1de   : > { %1554 = shalt.err (!%p1551_p4)  }
 0x1df   : > { %p2551_p6 = pmov %p2550_p5  ;;  %p2552_p3 = pmov %p2550_p5 }
 0x1e0   : > { %p574_p11 = scmp.gt.s32.totalorder %s2325_s23, 0  ;;  %p957_p0 = scmp.lt.s32.totalorder %s2325_s23, 999 }
 0x1e1   : > { %1058 = dma.hbm_to_vmem [thread:$0]  (%p2551_p6), %s558_s30, 16, %s569_s1, %s2162_s14 }
 0x1e2   : > { %s1062_s7 = scalar_select %p2552_p3, [#allocation5], [#allocation57] }
 0x1e3   : > { %p2553_p13 = pmov %p2552_p3  ;;  %s589_s29 = sshll.u32 %s786_s16, 4  ;;  %s590_s29 = int_to_ptr.vmem [resolvable:$true] %s589_s29 }
 0x1e4   : > { %s2669_s23 = smov (!%p574_p11, %s2325_s23), 0  ;;  %s971_s12 = sshll.u32 %s2587_s13, 3 }
 0x1e5   : > { %s2667_s8 = smov (!%p2553_p13, %s593_s8), 0  ;;  %s2671_s23 = smov (!%p957_p0, %s2669_s23), 999 }
 0x1e6   : > { %s2351_s2 = sld [smem:[%s1062_s7 + %s2667_s8]]  ;;  %s962_s20 = sshll.u32 %s2671_s23, 4 }
 0x1e7   : > { %s791_s9 = scalar_lea.vmem %s2140_s21, 7 [#allocation2]  ;;  %s579_s30 = scalar_lea.hbm %s2479_s5, %s962_s20 }
 0x1e8   : > { %s1555_s11 = scalar_lea.hbm %s579_s30, 16  ;;  %p2554_p5 = pmov %p2552_p3 }
 0x1e9   : > { %p1556_p1 = scmp.ne.s32.totalorder %s579_s30, %s1555_s11  ;;  %p1560_p2 = scmp.lt.u32.totalorder %s579_s30, %s2479_s5 }
 0x1ea   : > { %p1561_p7 = scmp.lt.u32.totalorder %s1896_s26, %s1555_s11  ;;  %p1563_p4 = scmp.lt.u32.totalorder %s1555_s11, %s579_s30 }
 0x1eb   : > { %p1557_p9 = pnand %p1556_p1, %p2554_p5 }
 0x1ec   : > { %p1562_p12 = por %p1561_p7, %p1560_p2 }
 0x1ed   : > { %p1558_p10 = pneg %p1557_p9 }
 0x1ee   : > { %p1564_p6 = por %p1563_p4, %p1562_p12 }
 0x1f0   : > { %p1565_p3 = pnand %p1564_p6, %p1558_p10 }
 0x1f2   : > { %1568 = shalt.err (!%p1565_p3)  }
 0x1f3   : > { %s1569_s21 = scalar_lea.vmem %s590_s29, 16  ;;  %p2555_p11 = pmov %p2554_p5 }
 0x1f4   : > { %p1570_p13 = scmp.ne.s32.totalorder %s590_s29, %s1569_s21  ;;  %p1576_p1 = scmp.lt.s32.totalorder %s590_s29, %s1873_s19 }
 0x1f5   : > { %p1577_p5 = scmp.lt.s32.totalorder %s1907_s0, %s1569_s21 }
 0x1f6   : > { %p1571_p0 = pnand %p1570_p13, %p2555_p11 }
 0x1f7   : > { %p1578_p9 = por %p1577_p5, %p1576_p1 }
 0x1f8   : > { %p1572_p8 = pneg %p1571_p0 }
 0x1fa   : > { %p1579_p2 = pnand %p1578_p9, %p1572_p8 }
 0x1fc   : > { %1582 = shalt.err (!%p1579_p2)  }
 0x1fd   : > { %p2556_p7 = pmov %p2555_p11  ;;  %p2557_p10 = scmp.gt.s32.totalorder %s2351_s2, 0 }
 0x1fe   : > { %p964_p12 = scmp.lt.s32.totalorder %s2351_s2, 999  ;;  %s610_s28 = sshll.u32 %s791_s9, 4  ;;  %s611_s28 = int_to_ptr.vmem [resolvable:$true] %s610_s28 }
 0x1ff   : > { %1061 = dma.hbm_to_vmem [thread:$0]  (%p2556_p7), %s579_s30, 16, %s590_s29, %s2162_s14 }
 0x200   : > { %s596_s23 = scalar_select %p2557_p10, %s2351_s2, 0 }
 0x201   : > { %p2558_p4 = pmov %p2556_p7 }
 0x202   : > { %s2673_s23 = smov (!%p964_p12, %s596_s23), 999 }
 0x203   : > { %s969_s4 = sshll.u32 %s2673_s23, 4 }
 0x204   : > { %s600_s20 = scalar_lea.hbm %s2479_s5, %s969_s4 }
 0x205   : > { %s1583_s17 = scalar_lea.hbm %s600_s20, 16  ;;  %p1588_p13 = scmp.lt.u32.totalorder %s600_s20, %s2479_s5 }
 0x206   : > { %p1584_p8 = scmp.ne.s32.totalorder %s600_s20, %s1583_s17  ;;  %p1589_p11 = scmp.lt.u32.totalorder %s1896_s26, %s1583_s17 }
 0x207   : > { %p1591_p1 = scmp.lt.u32.totalorder %s1583_s17, %s600_s20 }
 0x208   : > { %p1585_p6 = pnand %p1584_p8, %p2558_p4  ;;  %p1590_p0 = por %p1589_p11, %p1588_p13 }
 0x20a   : > { %p1586_p3 = pneg %p1585_p6  ;;  %p1592_p5 = por %p1591_p1, %p1590_p0 }
 0x20c   : > { %p1593_p9 = pnand %p1592_p5, %p1586_p3 }
 0x20e   : > { %1596 = shalt.err (!%p1593_p9)  }
 0x20f   : > { %s1597_s29 = scalar_lea.vmem %s611_s28, 16  ;;  %p2559_p7 = pmov %p2558_p4 }
 0x210   : > { %p1598_p2 = scmp.ne.s32.totalorder %s611_s28, %s1597_s29  ;;  %p1604_p8 = scmp.lt.s32.totalorder %s611_s28, %s1873_s19 }
 0x211   : > { %p1605_p4 = scmp.lt.s32.totalorder %s1907_s0, %s1597_s29 }
 0x212   : > { %p1599_p10 = pnand %p1598_p2, %p2559_p7 }
 0x213   : > { %p1606_p6 = por %p1605_p4, %p1604_p8 }
 0x214   : > { %p1600_p12 = pneg %p1599_p10 }
 0x216   : > { %p1607_p11 = pnand %p1606_p6, %p1600_p12 }
 0x218   : > { %1610 = shalt.err (!%p1607_p11)  }
 0x219   : > { %p2560_p13 = pmov %p2559_p7  ;;  %s235_s26 = scalar_lea.vmem [#allocation6], %s1835_s24 }
 0x21a   : > { %s615_s2 = scalar_lea.vmem [#allocation2], %s971_s12  ;;  %s616_s9 = scalar_lea.sflag [#allocation3], %s2587_s13 }
 0x21b   : > { %1064 = dma.hbm_to_vmem [thread:$0]  (%p2560_p13), %s600_s20, 16, %s611_s28, %s2162_s14 }
 0x21c   : > { %1673 = dma.done.wait %s616_s9, 128 }
 0x21d   : > { %1674 = vsyncadd %s616_s9, 4294967168  ;;  %v1720_v0 = vmov 0   ;;  %v625_v1 = vld [vmem:[%s1849_s18] sm:$0xff]  ;;  %v633_v3 = vlaneseq  ;;  %s2561_s13 = sld [smem:[#allocation72_spill]]  ;;  %s976_s16 = sshll.u32 %s1838_s25, 7 }
 0x21e   : > { %1148 = vset.pattern.permute.xlu0 %v1720_v0  ;;  %v626_v2 = vcvt.s32.f32 %v625_v1  ;;  %v623_v5 = vld [vmem:[%s2477_s3] sm:$0x1]  ;;  %v624_v6 = vld [vmem:[%s2477_s3 + $0x1] sm:$0x1]  ;;  %s687_s8 = sshll.u32 %s235_s26, 4  ;;  %s2562_s28 = sld [smem:[#allocation73_spill]]  ;;  %s2419_s8 = int_to_ptr.vmem [resolvable:$true] %s687_s8 }
 0x21f   : > { %v634_v4 = vshrl.u32 %v633_v3, 7  ;;  %v627_v8 = vsub.f32 %v624_v6, %v623_v5  ;;  %v620_v10 = vld [vmem:[%s615_s2] sm:$0xff]  ;;  %s2564_s7 = sand.u32 1, %s1685_s27   ;;  %s1611_s17 = scalar_lea.vmem %s2419_s8, 128 }
 0x220   : > { %630 = vperm.xlu0 %1148, %v626_v2   ;;  %v621_v11 = vld [vmem:[%s1854_s22] sm:$0xff]  ;;  %s672_s20 = scalar_lea.sflag [#allocation7], %s2564_s7  ;;  %p1612_p3 = scmp.ne.s32.totalorder %s2419_s8, %s1611_s17 }
 0x221   : > { %v635_v7 = vsub.s32 0, %v634_v4  ;;  %v622_v15 = vadd.f32 %v621_v11, %v620_v10  ;;  %p2565_p0 = scmp.ne.s32.totalorder %s2504_s15, 0  ;;  %s1721_s25 = smov [#allocation6]  }
 0x222   : > { %s1615_s1 = sshll.u32 %s1721_s25, 4  ;;  %s1616_s1 = int_to_ptr.vmem [resolvable:$false] %s1615_s1 }
 0x223   : > { %v636_v9 = vrot.slane %v627_v8, %v635_v7  ;;  %v641_v12 = vrot.slane %v623_v5, %v635_v7  ;;  %v972_v28 = vld [vmem:[%s2561_s13] ss:$0 sm:$0xff]  ;;  %v973_v30 = vld [vmem:[%s2561_s13 + $0x1] ss:$0 sm:$0xff]  ;;  %p1613_p1 = pnand %p1612_p3, %p2565_p0  ;;  %s1617_s11 = scalar_lea.vmem %s1616_s1, 256 }
 0x224   : > { %s2563_s4 = smov %s2562_s28  ;;  %s2417_s6 = scalar_lea.hbm %s2562_s28, %s976_s16 }
 0x225   : > { %p1614_p5 = pneg %p1613_p1  ;;  %p1618_p9 = scmp.lt.s32.totalorder %s2419_s8, %s1616_s1 }
 0x226   : > { %p1619_p2 = scmp.lt.s32.totalorder %s1617_s11, %s1611_s17 }
 0x228   : > { %p1620_p7 = por %p1619_p2, %p1618_p9 }
 0x22a   : > { %p1621_p10 = pnand %p1620_p7, %p1614_p5 }
 0x29f   : > { %v631_v13 = vpop.permute.xlu0 %630 }
 0x2a0   : > { %v637_v14 = vmul.f32 %v636_v9, %v631_v13 }
 0x2a2   : > { %v642_v16 = vadd.f32 %v641_v12, %v637_v14 }
 0x2a4   : > { %v643_v17 = vadd.f32 %v642_v16, %v622_v15 }
 0x2a6   : > { %644 = vadd.xlane.f32.xlu0 %v643_v17  ;;  %v648_v18 = vmul.f32 %v643_v17, %v643_v17 }
 0x2a8   : > { %649 = vadd.xlane.f32.xlu1 %v648_v18 }
 0x333   : > { %v645_v19 = vpop.xlane.xlu0 %644 }
 0x334   : > { %v647_v20 = vmul.f32 0.0078125, %v645_v19 }
 0x335   : > { %v650_v21 = vpop.xlane.xlu1 %649 }
 0x336   : > { %v652_v22 = vmul.f32 %v647_v20, %v647_v20  ;;  %v651_v23 = vmul.f32 0.0078125, %v650_v21  ;;  %v654_v26 = vsub.f32 %v643_v17, %v647_v20 }
 0x338   : > { %v653_v24 = vsub.f32 %v651_v23, %v652_v22 }
 0x33a   : > { %v655_v25 = vadd.f32 1e-12, %v653_v24 }
 0x33c   : > { %1149 = vrsqrt.f32 %v655_v25 }
 0x346   : > { %v1150_v27 = vpop.eup %1149 }
 0x347   : > { %v657_v29 = vmul.f32 %v1150_v27, %v654_v26 }
 0x349   : > { %v663_v31 = vmul.f32 %v972_v28, %v657_v29 }
 0x34b   : > { %v669_v32 = vadd.f32 %v973_v30, %v663_v31 }
 0x34d   : > { %670 = vst [vmem:[%s235_s26] sm:$0xff] %v669_v32 }
 0x34e   : > { %1624 = shalt.err (!%p1621_p10)
}
 0x34f   : > { %s1625_s24 = scalar_lea.hbm %s2417_s6, 128  ;;  %s1629_s2 = scalar_lea.hbm %s2563_s4, 1024 }
 0x350   : > { %p1626_p12 = scmp.ne.s32.totalorder %s2417_s6, %s1625_s24  ;;  %p1630_p6 = scmp.lt.u32.totalorder %s2417_s6, %s2563_s4 }
 0x351   : > { %p1631_p11 = scmp.lt.u32.totalorder %s1629_s2, %s1625_s24  ;;  %p1633_p3 = scmp.lt.u32.totalorder %s1625_s24, %s2417_s6 }
 0x352   : > { %p1627_p8 = pnand %p1626_p12, %p2565_p0 }
 0x353   : > { %p1632_p13 = por %p1631_p11, %p1630_p6 }
 0x354   : > { %p1628_p4 = pneg %p1627_p8 }
 0x355   : > { %p1634_p1 = por %p1633_p3, %p1632_p13 }
 0x357   : > { %p1635_p5 = pnand %p1634_p1, %p1628_p4 }
 0x359   : > { %1638 = shalt.err (!%p1635_p5)
}
 0x35a   : > { %1065 = dma.vmem_to_hbm [thread:$0]  (%p2565_p0), %s2419_s8, 128, %s2417_s6, %s672_s20  }
 0x35b PF: > { %s2566_s0 = sld [smem:[#allocation65_spill]]  ;;  %s2567_s10 = sld [smem:[#allocation61_spill]] }
 0x35c   : > { %s2568_s14 = sld [smem:[#allocation68_spill]] }
 0x361   : > { %p1073_p9 = scmp.ge.s32.totalorder %s2566_s0, 2  ;;  %s699_s22 = sand.u32 1, %s2567_s10  }
 0x362   : > { %p2569_p2 = scmp.ne.s32.totalorder %s2568_s14, 0  ;;  %s700_s18 = scalar_lea.sflag [#allocation7], %s699_s22 }
 0x364   : > { %p1068_p7 = pnand %p1073_p9, %p2569_p2 }
 0x366   : > { %1676 = dma.done.wait (!%p1068_p7), %s700_s18, 128  }
 0x367   : > { %1678 = vsyncadd (!%p1068_p7), %s700_s18, 4294967168  ;;  %s25_s8 = sadd.s32 1, %s2566_s0   ;;  %s2570_s12 = sld [smem:[#allocation62_spill]] }
 0x368   : > { %p22_p10 = scmp.ge.s32.totalorder %s25_s8, 10   ;;  %s2571_s0 = sld [smem:[#allocation69_spill]] }
 0x369   : > { %s2572_s28 = sld [smem:[#allocation63_spill]]  ;;  %s2573_s29 = sld [smem:[#allocation64_spill]] }
 0x36a   : > { %s2574_s30 = sld [smem:[#allocation66_spill]]  ;;  %s2575_s7 = sld [smem:[#allocation67_spill]] }
 0x36b   : > { %s2576_s26 = smov %s1685_s27  ;;  %24 = sbr.rel (!%p22_p10) target bundleno = 22 (0x16), region = 181 }
 0x36d   : > { %s2577_s27 = smov %s2570_s12 }
 0x372   :  { %705 = vsyncpa [#allocation7], 1 }
 0x373   :  { %707 = vsyncpa [#allocation7 + $0x1], 1 }
 0x374   :  { %708 = vsyncmov [#allocation3] }
 0x377   :  { %s709_s15 = vpop.sfrf %708 }
 0x378   :  { %p979_p0 = scmp.ne.s32.totalorder %s709_s15, 0 }
 0x37a   :  { %713 = shalt.err (%p979_p0)  }
 0x37b   :  { %715 = vsyncmov [#allocation3 + $0x1] }
 0x37e   :  { %s716_s16 = vpop.sfrf %715 }
 0x37f   :  { %p980_p12 = scmp.ne.s32.totalorder %s716_s16, 0 }
 0x381   :  { %720 = shalt.err (%p980_p12)  }

</bundles_post_ra>
